<compile_context>
chip_gen: v5e
topology: v5e:2x2
jax: 0.10.0
libtpu: 0.0.40
codegen_flags: <defaults>
</compile_context>

<pallas_src>
import functools

import jax
import jax.numpy as jnp
from jax import lax
from jax.experimental import pallas as pl
from jax.experimental.pallas import tpu as pltpu


def _mha_block_kernel(q_ref, k_ref, v_ref,
                      wq_ref, wk_ref, wv_ref, wo_ref,
                      bq_ref, bk_ref, bv_ref, bo_ref,
                      g_ref, beta_ref,
                      o_ref,
                      *, causal, layer_norm, ln_eps):
    f32 = jnp.float32
    q_in = q_ref[...].astype(f32)          # (BB, Sq, D)
    k_in = k_ref[...].astype(f32)          # (BB, Sk, D)
    v_in = v_ref[...].astype(f32)          # (BB, Sk, D)

    bb, sq, d = q_in.shape
    sk = k_in.shape[1]
    num_heads = wq_ref.shape[0]
    dh = wq_ref.shape[2]
    scale = 1.0 / float(dh) ** 0.5

    # Collapse (BB, S) -> rows for plain 2-D MXU matmuls.
    q2 = q_in.reshape(bb * sq, d)
    k2 = k_in.reshape(bb * sk, d)
    v2 = v_in.reshape(bb * sk, d)

    if causal:
        row = lax.broadcasted_iota(jnp.int32, (sq, sk), 0)
        col = lax.broadcasted_iota(jnp.int32, (sq, sk), 1)
        neg = jnp.where(col > row, jnp.float32(-1e30), jnp.float32(0.0))

    out_acc = jnp.zeros((bb * sq, d), dtype=f32)
    for h in range(num_heads):
        # Per-head input projections (weights pre-transposed to (in, out)).
        qh = (jnp.dot(q2, wq_ref[h], preferred_element_type=f32)
              + bq_ref[h]).reshape(bb, sq, dh)
        kh = (jnp.dot(k2, wk_ref[h], preferred_element_type=f32)
              + bk_ref[h]).reshape(bb, sk, dh)
        vh = (jnp.dot(v2, wv_ref[h], preferred_element_type=f32)
              + bv_ref[h]).reshape(bb, sk, dh)

        s = jnp.einsum('bqd,bkd->bqk', qh, kh,
                       preferred_element_type=f32) * scale       # (BB, Sq, Sk)
        if causal:
            s = s + neg[None, :, :]
        s = s - jnp.max(s, axis=-1, keepdims=True)
        p = jnp.exp(s)
        p = p / jnp.sum(p, axis=-1, keepdims=True)
        # TODO(synk): attention-weight dropout (inference: identity).

        ctx_h = jnp.einsum('bqk,bkd->bqd', p, vh,
                           preferred_element_type=f32)            # (BB, Sq, Dh)
        # Fold this head's slice of the output projection directly into the
        # accumulator (avoids concatenating heads / lane-dim slicing).
        out_acc = out_acc + jnp.dot(ctx_h.reshape(bb * sq, dh), wo_ref[h],
                                    preferred_element_type=f32)

    out = out_acc + bo_ref[...].astype(f32)
    # TODO(synk): outer dropout (inference: identity).
    out = out + q2                                                 # residual

    if layer_norm:
        mu = jnp.mean(out, axis=-1, keepdims=True)
        var = jnp.mean((out - mu) ** 2, axis=-1, keepdims=True)
        out = (out - mu) * lax.rsqrt(var + ln_eps)
        out = out * g_ref[...].astype(f32) + beta_ref[...].astype(f32)

    # Single full-tile, unmasked store of the output block.
    o_ref[...] = out.reshape(bb, sq, d).astype(o_ref.dtype)


def _pick_block_batch(b, sq, sk, d, itemsize, vmem_budget=16 * 1024 * 1024):
    """Batch elements per grid step: as many as comfortably fit in VMEM."""
    per_b = (2 * sq * d + 2 * sk * d) * itemsize * 2   # q,out + k,v, double-buffered
    bb = max(1, min(b, vmem_budget // max(per_b, 1)))
    # If tiles are already big, keep >=2 grid steps so v7x megacore can split.
    if bb == b and b > 1 and per_b * (b // 2) >= (1 << 20):
        bb = b // 2
    while b % bb:
        bb -= 1
    return bb


def multi_head_attention_block(query, key, value, params, *, num_heads,
                               layer_normalization=True,
                               apply_causal_mask=False,
                               ln_eps=1e-5, block_batch=None):
    """query/key/value: (B, S, D) with batch_first=True semantics."""
    b, sq, d = query.shape
    sk = key.shape[1]
    if d % num_heads:
        raise ValueError(f'Embedding dimension {d} not divisible by {num_heads}')
    dh = d // num_heads

    in_w = params['in_proj_weight']          # (3D, D) as in nn.MultiheadAttention
    in_b = params['in_proj_bias']            # (3D,)
    wq, wk, wv = in_w[:d], in_w[d:2 * d], in_w[2 * d:]

    def per_head_in(w):                       # (D_out, D_in) -> (H, D_in, Dh)
        return jnp.transpose(w.T.reshape(d, num_heads, dh), (1, 0, 2))

    wq_h, wk_h, wv_h = per_head_in(wq), per_head_in(wk), per_head_in(wv)
    wo_h = params['out_proj_weight'].T.reshape(num_heads, dh, d)   # (H, Dh, D)
    bq_h = in_b[:d].reshape(num_heads, 1, dh)
    bk_h = in_b[d:2 * d].reshape(num_heads, 1, dh)
    bv_h = in_b[2 * d:].reshape(num_heads, 1, dh)
    bo2 = params['out_proj_bias'].reshape(1, d)
    gamma2 = params['ln_weight'].reshape(1, d)
    beta2 = params['ln_bias'].reshape(1, d)

    if block_batch is None:
        block_batch = _pick_block_batch(b, sq, sk, d,
                                        jnp.dtype(query.dtype).itemsize)
    bb = block_batch
    grid = (b // bb,)

    kernel = functools.partial(_mha_block_kernel,
                               causal=bool(apply_causal_mask),
                               layer_norm=bool(layer_normalization),
                               ln_eps=float(ln_eps))

    bcast3 = lambda i: (0, 0, 0)
    bcast2 = lambda i: (0, 0)

    return pl.pallas_call(
        kernel,
        out_shape=jax.ShapeDtypeStruct((b, sq, d), query.dtype),
        grid_spec=pltpu.PrefetchScalarGridSpec(
            num_scalar_prefetch=0,
            grid=grid,
            in_specs=[
                pl.BlockSpec((bb, sq, d), lambda i: (i, 0, 0)),   # query
                pl.BlockSpec((bb, sk, d), lambda i: (i, 0, 0)),   # key
                pl.BlockSpec((bb, sk, d), lambda i: (i, 0, 0)),   # value
                pl.BlockSpec((num_heads, d, dh), bcast3),         # Wq per head
                pl.BlockSpec((num_heads, d, dh), bcast3),         # Wk per head
                pl.BlockSpec((num_heads, d, dh), bcast3),         # Wv per head
                pl.BlockSpec((num_heads, dh, d), bcast3),         # Wo per head
                pl.BlockSpec((num_heads, 1, dh), bcast3),         # bq per head
                pl.BlockSpec((num_heads, 1, dh), bcast3),         # bk per head
                pl.BlockSpec((num_heads, 1, dh), bcast3),         # bv per head
                pl.BlockSpec((1, d), bcast2),                     # bo
                pl.BlockSpec((1, d), bcast2),                     # LN gamma
                pl.BlockSpec((1, d), bcast2),                     # LN beta
            ],
            out_specs=pl.BlockSpec((bb, sq, d), lambda i: (i, 0, 0)),
        ),
        compiler_params=pltpu.CompilerParams(
            dimension_semantics=("parallel",),
        ),
    )(query, key, value, wq_h, wk_h, wv_h, wo_h, bq_h, bk_h, bv_h,
      bo2, gamma2, beta2)


def _reference(query, key, value, params, num_heads,
               layer_normalization=True, apply_causal_mask=False, ln_eps=1e-5):
    """Pure-JAX replica of the PyTorch block (inference mode)."""
    b, sq, d = query.shape
    sk = key.shape[1]
    dh = d // num_heads
    in_w, in_b = params['in_proj_weight'], params['in_proj_bias']
    q = query @ in_w[:d].T + in_b[:d]
    k = key @ in_w[d:2 * d].T + in_b[d:2 * d]
    v = value @ in_w[2 * d:].T + in_b[2 * d:]

    def split(x, s):
        return x.reshape(b, s, num_heads, dh).transpose(0, 2, 1, 3)

    qh, kh, vh = split(q, sq), split(k, sk), split(v, sk)
    scores = jnp.einsum('bhqd,bhkd->bhqk', qh, kh) / jnp.sqrt(dh)
    if apply_causal_mask:
        mask = jnp.triu(jnp.ones((sq, sk), dtype=bool), k=1)
        scores = jnp.where(mask[None, None], -jnp.inf, scores)
    p = jax.nn.softmax(scores, axis=-1)
    ctx = jnp.einsum('bhqk,bhkd->bhqd', p, vh).transpose(0, 2, 1, 3).reshape(b, sq, d)
    out = ctx @ params['out_proj_weight'].T + params['out_proj_bias']
    out = out + query
    if layer_normalization:
        mu = out.mean(-1, keepdims=True)
        var = ((out - mu) ** 2).mean(-1, keepdims=True)
        out = (out - mu) / jnp.sqrt(var + ln_eps)
        out = out * params['ln_weight'] + params['ln_bias']
    return out


if __name__ == "__main__":
    key0 = jax.random.PRNGKey(0)
    ks = jax.random.split(key0, 8)

    B, S, D, H = 2, 8, 32, 4
    query = jax.random.normal(ks[0], (B, S, D), dtype=jnp.float32)
    key_t = jax.random.normal(ks[1], (B, S, D), dtype=jnp.float32)
    value = jax.random.normal(ks[2], (B, S, D), dtype=jnp.float32)

    params = {
        'in_proj_weight': 0.1 * jax.random.normal(ks[3], (3 * D, D), jnp.float32),
        'in_proj_bias': 0.1 * jax.random.normal(ks[4], (3 * D,), jnp.float32),
        'out_proj_weight': 0.1 * jax.random.normal(ks[5], (D, D), jnp.float32),
        'out_proj_bias': 0.1 * jax.random.normal(ks[6], (D,), jnp.float32),
        'ln_weight': jnp.ones((D,), jnp.float32),
        'ln_bias': jnp.zeros((D,), jnp.float32),
    }

    # Default path: self/cross attention, no causal mask, LayerNorm on.
    out = multi_head_attention_block(query, key_t, value, params, num_heads=H)
    out = jax.block_until_ready(out)
    ref = _reference(query, key_t, value, params, H)
    assert out.shape == (B, S, D), out.shape
    err = float(jnp.max(jnp.abs(out - ref)))
    assert jnp.allclose(out, ref, atol=2e-3, rtol=2e-3), f"max abs err={err}"

    # Causal self-attention path.
    out_c = multi_head_attention_block(query, query, query, params, num_heads=H,
                                       apply_causal_mask=True)
    out_c = jax.block_until_ready(out_c)
    ref_c = _reference(query, query, query, params, H, apply_causal_mask=True)
    err_c = float(jnp.max(jnp.abs(out_c - ref_c)))
    assert jnp.allclose(out_c, ref_c, atol=2e-3, rtol=2e-3), f"max abs err={err_c}"

    print("KERNEL_OK")
</pallas_src>

<mosaic_0001>
module attributes {stable_mosaic.version = 11 : i64} {
  func.func @_mha_block_kernel(%arg0: i32, %arg1: memref<2x8x32xf32, #tpu.memory_space<vmem>>, %arg2: memref<2x8x32xf32, #tpu.memory_space<vmem>>, %arg3: memref<2x8x32xf32, #tpu.memory_space<vmem>>, %arg4: memref<4x32x8xf32, #tpu.memory_space<vmem>>, %arg5: memref<4x32x8xf32, #tpu.memory_space<vmem>>, %arg6: memref<4x32x8xf32, #tpu.memory_space<vmem>>, %arg7: memref<4x8x32xf32, #tpu.memory_space<vmem>>, %arg8: memref<4x1x8xf32, #tpu.memory_space<vmem>>, %arg9: memref<4x1x8xf32, #tpu.memory_space<vmem>>, %arg10: memref<4x1x8xf32, #tpu.memory_space<vmem>>, %arg11: memref<1x32xf32, #tpu.memory_space<vmem>>, %arg12: memref<1x32xf32, #tpu.memory_space<vmem>>, %arg13: memref<1x32xf32, #tpu.memory_space<vmem>>, %arg14: memref<2x8x32xf32, #tpu.memory_space<vmem>>) attributes {dimension_semantics = [#tpu.dimension_semantics<parallel>], iteration_bounds = array<i64: 1>, scalar_prefetch = 0 : i64, scratch_operands = 0 : i64, tpu.core_type = #tpu.core_type<tc>, window_params = [{transform_indices = @transform_0, window_bounds = array<i64: 2, 8, 32>}, {transform_indices = @transform_1, window_bounds = array<i64: 2, 8, 32>}, {transform_indices = @transform_2, window_bounds = array<i64: 2, 8, 32>}, {pipeline_mode = #tpu.pipeline_mode<synchronous>, transform_indices = @transform_3, window_bounds = array<i64: 4, 32, 8>}, {pipeline_mode = #tpu.pipeline_mode<synchronous>, transform_indices = @transform_4, window_bounds = array<i64: 4, 32, 8>}, {pipeline_mode = #tpu.pipeline_mode<synchronous>, transform_indices = @transform_5, window_bounds = array<i64: 4, 32, 8>}, {pipeline_mode = #tpu.pipeline_mode<synchronous>, transform_indices = @transform_6, window_bounds = array<i64: 4, 8, 32>}, {pipeline_mode = #tpu.pipeline_mode<synchronous>, transform_indices = @transform_7, window_bounds = array<i64: 4, 1, 8>}, {pipeline_mode = #tpu.pipeline_mode<synchronous>, transform_indices = @transform_8, window_bounds = array<i64: 4, 1, 8>}, {pipeline_mode = #tpu.pipeline_mode<synchronous>, transform_indices = @transform_9, window_bounds = array<i64: 4, 1, 8>}, {pipeline_mode = #tpu.pipeline_mode<synchronous>, transform_indices = @transform_10, window_bounds = array<i64: 1, 32>}, {pipeline_mode = #tpu.pipeline_mode<synchronous>, transform_indices = @transform_11, window_bounds = array<i64: 1, 32>}, {pipeline_mode = #tpu.pipeline_mode<synchronous>, transform_indices = @transform_12, window_bounds = array<i64: 1, 32>}, {transform_indices = @transform_13, window_bounds = array<i64: 2, 8, 32>}]} {
    %c0 = arith.constant 0 : index
    %c0_0 = arith.constant 0 : index
    %c0_1 = arith.constant 0 : index
    %0 = vector.load %arg1[%c0, %c0_0, %c0_1] : memref<2x8x32xf32, #tpu.memory_space<vmem>>, vector<2x8x32xf32>
    %c0_2 = arith.constant 0 : index
    %c0_3 = arith.constant 0 : index
    %c0_4 = arith.constant 0 : index
    %1 = vector.load %arg2[%c0_2, %c0_3, %c0_4] : memref<2x8x32xf32, #tpu.memory_space<vmem>>, vector<2x8x32xf32>
    %c0_5 = arith.constant 0 : index
    %c0_6 = arith.constant 0 : index
    %c0_7 = arith.constant 0 : index
    %2 = vector.load %arg3[%c0_5, %c0_6, %c0_7] : memref<2x8x32xf32, #tpu.memory_space<vmem>>, vector<2x8x32xf32>
    %3 = vector.shape_cast %0 : vector<2x8x32xf32> to vector<16x32xf32>
    %4 = vector.shape_cast %1 : vector<2x8x32xf32> to vector<16x32xf32>
    %5 = vector.shape_cast %2 : vector<2x8x32xf32> to vector<16x32xf32>
    %cst = arith.constant 0.000000e+00 : f32
    %6 = vector.broadcast %cst : f32 to vector<16x32xf32>
    %c0_8 = arith.constant 0 : index
    %c0_9 = arith.constant 0 : index
    %c0_10 = arith.constant 0 : index
    %7 = vector.load %arg4[%c0_8, %c0_9, %c0_10] : memref<4x32x8xf32, #tpu.memory_space<vmem>>, vector<1x32x8xf32>
    %8 = vector.shape_cast %7 : vector<1x32x8xf32> to vector<32x8xf32>
    %cst_11 = arith.constant dense<0.000000e+00> : vector<16x8xf32>
    %9 = tpu.matmul %3, %8, %cst_11 {dimension_numbers = #tpu.dot_dimension_numbers<[1], [0], [0], [1], [0, 0, 1, 1], [], []>} : vector<16x32xf32>, vector<32x8xf32>, vector<16x8xf32> -> vector<16x8xf32>
    %c0_12 = arith.constant 0 : index
    %c0_13 = arith.constant 0 : index
    %c0_14 = arith.constant 0 : index
    %10 = vector.load %arg8[%c0_12, %c0_13, %c0_14] : memref<4x1x8xf32, #tpu.memory_space<vmem>>, vector<1x1x8xf32>
    %11 = vector.shape_cast %10 : vector<1x1x8xf32> to vector<1x8xf32>
    %12 = vector.broadcast %11 : vector<1x8xf32> to vector<16x8xf32>
    %13 = arith.addf %9, %12 : vector<16x8xf32>
    %14 = vector.shape_cast %13 : vector<16x8xf32> to vector<2x8x8xf32>
    %c0_15 = arith.constant 0 : index
    %c0_16 = arith.constant 0 : index
    %c0_17 = arith.constant 0 : index
    %15 = vector.load %arg5[%c0_15, %c0_16, %c0_17] : memref<4x32x8xf32, #tpu.memory_space<vmem>>, vector<1x32x8xf32>
    %16 = vector.shape_cast %15 : vector<1x32x8xf32> to vector<32x8xf32>
    %cst_18 = arith.constant dense<0.000000e+00> : vector<16x8xf32>
    %17 = tpu.matmul %4, %16, %cst_18 {dimension_numbers = #tpu.dot_dimension_numbers<[1], [0], [0], [1], [0, 0, 1, 1], [], []>} : vector<16x32xf32>, vector<32x8xf32>, vector<16x8xf32> -> vector<16x8xf32>
    %c0_19 = arith.constant 0 : index
    %c0_20 = arith.constant 0 : index
    %c0_21 = arith.constant 0 : index
    %18 = vector.load %arg9[%c0_19, %c0_20, %c0_21] : memref<4x1x8xf32, #tpu.memory_space<vmem>>, vector<1x1x8xf32>
    %19 = vector.shape_cast %18 : vector<1x1x8xf32> to vector<1x8xf32>
    %20 = vector.broadcast %19 : vector<1x8xf32> to vector<16x8xf32>
    %21 = arith.addf %17, %20 : vector<16x8xf32>
    %22 = vector.shape_cast %21 : vector<16x8xf32> to vector<2x8x8xf32>
    %c0_22 = arith.constant 0 : index
    %c0_23 = arith.constant 0 : index
    %c0_24 = arith.constant 0 : index
    %23 = vector.load %arg6[%c0_22, %c0_23, %c0_24] : memref<4x32x8xf32, #tpu.memory_space<vmem>>, vector<1x32x8xf32>
    %24 = vector.shape_cast %23 : vector<1x32x8xf32> to vector<32x8xf32>
    %cst_25 = arith.constant dense<0.000000e+00> : vector<16x8xf32>
    %25 = tpu.matmul %5, %24, %cst_25 {dimension_numbers = #tpu.dot_dimension_numbers<[1], [0], [0], [1], [0, 0, 1, 1], [], []>} : vector<16x32xf32>, vector<32x8xf32>, vector<16x8xf32> -> vector<16x8xf32>
    %c0_26 = arith.constant 0 : index
    %c0_27 = arith.constant 0 : index
    %c0_28 = arith.constant 0 : index
    %26 = vector.load %arg10[%c0_26, %c0_27, %c0_28] : memref<4x1x8xf32, #tpu.memory_space<vmem>>, vector<1x1x8xf32>
    %27 = vector.shape_cast %26 : vector<1x1x8xf32> to vector<1x8xf32>
    %28 = vector.broadcast %27 : vector<1x8xf32> to vector<16x8xf32>
    %29 = arith.addf %25, %28 : vector<16x8xf32>
    %30 = vector.shape_cast %29 : vector<16x8xf32> to vector<2x8x8xf32>
    "tpu.trace_start"() <{level = 10 : i32, message = "bqd,bkd->bqk"}> : () -> ()
    %cst_29 = arith.constant dense<0.000000e+00> : vector<2x8x8xf32>
    %31 = tpu.matmul %14, %22, %cst_29 {dimension_numbers = #tpu.dot_dimension_numbers<[2], [2], [1], [1], [0, 0, 0, 1, 1, 1], [0], [0]>} : vector<2x8x8xf32>, vector<2x8x8xf32>, vector<2x8x8xf32> -> vector<2x8x8xf32>
    "tpu.trace_stop"() : () -> ()
    %cst_30 = arith.constant 0.353553385 : f32
    %32 = vector.broadcast %cst_30 : f32 to vector<2x8x8xf32>
    %33 = arith.mulf %31, %32 : vector<2x8x8xf32>
    %cst_31 = arith.constant dense<0xFF800000> : vector<2x8xf32>
    %34 = vector.multi_reduction <maximumf>, %33, %cst_31 [2] : vector<2x8x8xf32> to vector<2x8xf32>
    %35 = vector.shape_cast %34 : vector<2x8xf32> to vector<2x8x1xf32>
    %36 = vector.broadcast %35 : vector<2x8x1xf32> to vector<2x8x8xf32>
    %37 = arith.subf %33, %36 : vector<2x8x8xf32>
    %38 = math.exp %37 : vector<2x8x8xf32>
    %cst_32 = arith.constant dense<0.000000e+00> : vector<2x8xf32>
    %39 = vector.multi_reduction <add>, %38, %cst_32 [2] : vector<2x8x8xf32> to vector<2x8xf32>
    %40 = vector.shape_cast %39 : vector<2x8xf32> to vector<2x8x1xf32>
    %41 = vector.broadcast %40 : vector<2x8x1xf32> to vector<2x8x8xf32>
    %42 = arith.divf %38, %41 : vector<2x8x8xf32>
    "tpu.trace_start"() <{level = 10 : i32, message = "bqk,bkd->bqd"}> : () -> ()
    %cst_33 = arith.constant dense<0.000000e+00> : vector<2x8x8xf32>
    %43 = tpu.matmul %42, %30, %cst_33 {dimension_numbers = #tpu.dot_dimension_numbers<[2], [1], [1], [2], [0, 0, 0, 1, 1, 2], [0], [0]>} : vector<2x8x8xf32>, vector<2x8x8xf32>, vector<2x8x8xf32> -> vector<2x8x8xf32>
    "tpu.trace_stop"() : () -> ()
    %44 = vector.shape_cast %43 : vector<2x8x8xf32> to vector<16x8xf32>
    %c0_34 = arith.constant 0 : index
    %c0_35 = arith.constant 0 : index
    %c0_36 = arith.constant 0 : index
    %45 = vector.load %arg7[%c0_34, %c0_35, %c0_36] : memref<4x8x32xf32, #tpu.memory_space<vmem>>, vector<1x8x32xf32>
    %46 = vector.shape_cast %45 : vector<1x8x32xf32> to vector<8x32xf32>
    %cst_37 = arith.constant dense<0.000000e+00> : vector<16x32xf32>
    %47 = tpu.matmul %44, %46, %cst_37 {dimension_numbers = #tpu.dot_dimension_numbers<[1], [0], [0], [1], [0, 0, 1, 1], [], []>} : vector<16x8xf32>, vector<8x32xf32>, vector<16x32xf32> -> vector<16x32xf32>
    %48 = arith.addf %6, %47 : vector<16x32xf32>
    %c1 = arith.constant 1 : index
    %c0_38 = arith.constant 0 : index
    %c0_39 = arith.constant 0 : index
    %49 = vector.load %arg4[%c1, %c0_38, %c0_39] : memref<4x32x8xf32, #tpu.memory_space<vmem>>, vector<1x32x8xf32>
    %50 = vector.shape_cast %49 : vector<1x32x8xf32> to vector<32x8xf32>
    %cst_40 = arith.constant dense<0.000000e+00> : vector<16x8xf32>
    %51 = tpu.matmul %3, %50, %cst_40 {dimension_numbers = #tpu.dot_dimension_numbers<[1], [0], [0], [1], [0, 0, 1, 1], [], []>} : vector<16x32xf32>, vector<32x8xf32>, vector<16x8xf32> -> vector<16x8xf32>
    %c1_41 = arith.constant 1 : index
    %c0_42 = arith.constant 0 : index
    %c0_43 = arith.constant 0 : index
    %52 = vector.load %arg8[%c1_41, %c0_42, %c0_43] : memref<4x1x8xf32, #tpu.memory_space<vmem>>, vector<1x1x8xf32>
    %53 = vector.shape_cast %52 : vector<1x1x8xf32> to vector<1x8xf32>
    %54 = vector.broadcast %53 : vector<1x8xf32> to vector<16x8xf32>
    %55 = arith.addf %51, %54 : vector<16x8xf32>
    %56 = vector.shape_cast %55 : vector<16x8xf32> to vector<2x8x8xf32>
    %c1_44 = arith.constant 1 : index
    %c0_45 = arith.constant 0 : index
    %c0_46 = arith.constant 0 : index
    %57 = vector.load %arg5[%c1_44, %c0_45, %c0_46] : memref<4x32x8xf32, #tpu.memory_space<vmem>>, vector<1x32x8xf32>
    %58 = vector.shape_cast %57 : vector<1x32x8xf32> to vector<32x8xf32>
    %cst_47 = arith.constant dense<0.000000e+00> : vector<16x8xf32>
    %59 = tpu.matmul %4, %58, %cst_47 {dimension_numbers = #tpu.dot_dimension_numbers<[1], [0], [0], [1], [0, 0, 1, 1], [], []>} : vector<16x32xf32>, vector<32x8xf32>, vector<16x8xf32> -> vector<16x8xf32>
    %c1_48 = arith.constant 1 : index
    %c0_49 = arith.constant 0 : index
    %c0_50 = arith.constant 0 : index
    %60 = vector.load %arg9[%c1_48, %c0_49, %c0_50] : memref<4x1x8xf32, #tpu.memory_space<vmem>>, vector<1x1x8xf32>
    %61 = vector.shape_cast %60 : vector<1x1x8xf32> to vector<1x8xf32>
    %62 = vector.broadcast %61 : vector<1x8xf32> to vector<16x8xf32>
    %63 = arith.addf %59, %62 : vector<16x8xf32>
    %64 = vector.shape_cast %63 : vector<16x8xf32> to vector<2x8x8xf32>
    %c1_51 = arith.constant 1 : index
    %c0_52 = arith.constant 0 : index
    %c0_53 = arith.constant 0 : index
    %65 = vector.load %arg6[%c1_51, %c0_52, %c0_53] : memref<4x32x8xf32, #tpu.memory_space<vmem>>, vector<1x32x8xf32>
    %66 = vector.shape_cast %65 : vector<1x32x8xf32> to vector<32x8xf32>
    %cst_54 = arith.constant dense<0.000000e+00> : vector<16x8xf32>
    %67 = tpu.matmul %5, %66, %cst_54 {dimension_numbers = #tpu.dot_dimension_numbers<[1], [0], [0], [1], [0, 0, 1, 1], [], []>} : vector<16x32xf32>, vector<32x8xf32>, vector<16x8xf32> -> vector<16x8xf32>
    %c1_55 = arith.constant 1 : index
    %c0_56 = arith.constant 0 : index
    %c0_57 = arith.constant 0 : index
    %68 = vector.load %arg10[%c1_55, %c0_56, %c0_57] : memref<4x1x8xf32, #tpu.memory_space<vmem>>, vector<1x1x8xf32>
    %69 = vector.shape_cast %68 : vector<1x1x8xf32> to vector<1x8xf32>
    %70 = vector.broadcast %69 : vector<1x8xf32> to vector<16x8xf32>
    %71 = arith.addf %67, %70 : vector<16x8xf32>
    %72 = vector.shape_cast %71 : vector<16x8xf32> to vector<2x8x8xf32>
    "tpu.trace_start"() <{level = 10 : i32, message = "bqd,bkd->bqk"}> : () -> ()
    %cst_58 = arith.constant dense<0.000000e+00> : vector<2x8x8xf32>
    %73 = tpu.matmul %56, %64, %cst_58 {dimension_numbers = #tpu.dot_dimension_numbers<[2], [2], [1], [1], [0, 0, 0, 1, 1, 1], [0], [0]>} : vector<2x8x8xf32>, vector<2x8x8xf32>, vector<2x8x8xf32> -> vector<2x8x8xf32>
    "tpu.trace_stop"() : () -> ()
    %cst_59 = arith.constant 0.353553385 : f32
    %74 = vector.broadcast %cst_59 : f32 to vector<2x8x8xf32>
    %75 = arith.mulf %73, %74 : vector<2x8x8xf32>
    %cst_60 = arith.constant dense<0xFF800000> : vector<2x8xf32>
    %76 = vector.multi_reduction <maximumf>, %75, %cst_60 [2] : vector<2x8x8xf32> to vector<2x8xf32>
    %77 = vector.shape_cast %76 : vector<2x8xf32> to vector<2x8x1xf32>
    %78 = vector.broadcast %77 : vector<2x8x1xf32> to vector<2x8x8xf32>
    %79 = arith.subf %75, %78 : vector<2x8x8xf32>
    %80 = math.exp %79 : vector<2x8x8xf32>
    %cst_61 = arith.constant dense<0.000000e+00> : vector<2x8xf32>
    %81 = vector.multi_reduction <add>, %80, %cst_61 [2] : vector<2x8x8xf32> to vector<2x8xf32>
    %82 = vector.shape_cast %81 : vector<2x8xf32> to vector<2x8x1xf32>
    %83 = vector.broadcast %82 : vector<2x8x1xf32> to vector<2x8x8xf32>
    %84 = arith.divf %80, %83 : vector<2x8x8xf32>
    "tpu.trace_start"() <{level = 10 : i32, message = "bqk,bkd->bqd"}> : () -> ()
    %cst_62 = arith.constant dense<0.000000e+00> : vector<2x8x8xf32>
    %85 = tpu.matmul %84, %72, %cst_62 {dimension_numbers = #tpu.dot_dimension_numbers<[2], [1], [1], [2], [0, 0, 0, 1, 1, 2], [0], [0]>} : vector<2x8x8xf32>, vector<2x8x8xf32>, vector<2x8x8xf32> -> vector<2x8x8xf32>
    "tpu.trace_stop"() : () -> ()
    %86 = vector.shape_cast %85 : vector<2x8x8xf32> to vector<16x8xf32>
    %c1_63 = arith.constant 1 : index
    %c0_64 = arith.constant 0 : index
    %c0_65 = arith.constant 0 : index
    %87 = vector.load %arg7[%c1_63, %c0_64, %c0_65] : memref<4x8x32xf32, #tpu.memory_space<vmem>>, vector<1x8x32xf32>
    %88 = vector.shape_cast %87 : vector<1x8x32xf32> to vector<8x32xf32>
    %cst_66 = arith.constant dense<0.000000e+00> : vector<16x32xf32>
    %89 = tpu.matmul %86, %88, %cst_66 {dimension_numbers = #tpu.dot_dimension_numbers<[1], [0], [0], [1], [0, 0, 1, 1], [], []>} : vector<16x8xf32>, vector<8x32xf32>, vector<16x32xf32> -> vector<16x32xf32>
    %90 = arith.addf %48, %89 : vector<16x32xf32>
    %c2 = arith.constant 2 : index
    %c0_67 = arith.constant 0 : index
    %c0_68 = arith.constant 0 : index
    %91 = vector.load %arg4[%c2, %c0_67, %c0_68] : memref<4x32x8xf32, #tpu.memory_space<vmem>>, vector<1x32x8xf32>
    %92 = vector.shape_cast %91 : vector<1x32x8xf32> to vector<32x8xf32>
    %cst_69 = arith.constant dense<0.000000e+00> : vector<16x8xf32>
    %93 = tpu.matmul %3, %92, %cst_69 {dimension_numbers = #tpu.dot_dimension_numbers<[1], [0], [0], [1], [0, 0, 1, 1], [], []>} : vector<16x32xf32>, vector<32x8xf32>, vector<16x8xf32> -> vector<16x8xf32>
    %c2_70 = arith.constant 2 : index
    %c0_71 = arith.constant 0 : index
    %c0_72 = arith.constant 0 : index
    %94 = vector.load %arg8[%c2_70, %c0_71, %c0_72] : memref<4x1x8xf32, #tpu.memory_space<vmem>>, vector<1x1x8xf32>
    %95 = vector.shape_cast %94 : vector<1x1x8xf32> to vector<1x8xf32>
    %96 = vector.broadcast %95 : vector<1x8xf32> to vector<16x8xf32>
    %97 = arith.addf %93, %96 : vector<16x8xf32>
    %98 = vector.shape_cast %97 : vector<16x8xf32> to vector<2x8x8xf32>
    %c2_73 = arith.constant 2 : index
    %c0_74 = arith.constant 0 : index
    %c0_75 = arith.constant 0 : index
    %99 = vector.load %arg5[%c2_73, %c0_74, %c0_75] : memref<4x32x8xf32, #tpu.memory_space<vmem>>, vector<1x32x8xf32>
    %100 = vector.shape_cast %99 : vector<1x32x8xf32> to vector<32x8xf32>
    %cst_76 = arith.constant dense<0.000000e+00> : vector<16x8xf32>
    %101 = tpu.matmul %4, %100, %cst_76 {dimension_numbers = #tpu.dot_dimension_numbers<[1], [0], [0], [1], [0, 0, 1, 1], [], []>} : vector<16x32xf32>, vector<32x8xf32>, vector<16x8xf32> -> vector<16x8xf32>
    %c2_77 = arith.constant 2 : index
    %c0_78 = arith.constant 0 : index
    %c0_79 = arith.constant 0 : index
    %102 = vector.load %arg9[%c2_77, %c0_78, %c0_79] : memref<4x1x8xf32, #tpu.memory_space<vmem>>, vector<1x1x8xf32>
    %103 = vector.shape_cast %102 : vector<1x1x8xf32> to vector<1x8xf32>
    %104 = vector.broadcast %103 : vector<1x8xf32> to vector<16x8xf32>
    %105 = arith.addf %101, %104 : vector<16x8xf32>
    %106 = vector.shape_cast %105 : vector<16x8xf32> to vector<2x8x8xf32>
    %c2_80 = arith.constant 2 : index
    %c0_81 = arith.constant 0 : index
    %c0_82 = arith.constant 0 : index
    %107 = vector.load %arg6[%c2_80, %c0_81, %c0_82] : memref<4x32x8xf32, #tpu.memory_space<vmem>>, vector<1x32x8xf32>
    %108 = vector.shape_cast %107 : vector<1x32x8xf32> to vector<32x8xf32>
    %cst_83 = arith.constant dense<0.000000e+00> : vector<16x8xf32>
    %109 = tpu.matmul %5, %108, %cst_83 {dimension_numbers = #tpu.dot_dimension_numbers<[1], [0], [0], [1], [0, 0, 1, 1], [], []>} : vector<16x32xf32>, vector<32x8xf32>, vector<16x8xf32> -> vector<16x8xf32>
    %c2_84 = arith.constant 2 : index
    %c0_85 = arith.constant 0 : index
    %c0_86 = arith.constant 0 : index
    %110 = vector.load %arg10[%c2_84, %c0_85, %c0_86] : memref<4x1x8xf32, #tpu.memory_space<vmem>>, vector<1x1x8xf32>
    %111 = vector.shape_cast %110 : vector<1x1x8xf32> to vector<1x8xf32>
    %112 = vector.broadcast %111 : vector<1x8xf32> to vector<16x8xf32>
    %113 = arith.addf %109, %112 : vector<16x8xf32>
    %114 = vector.shape_cast %113 : vector<16x8xf32> to vector<2x8x8xf32>
    "tpu.trace_start"() <{level = 10 : i32, message = "bqd,bkd->bqk"}> : () -> ()
    %cst_87 = arith.constant dense<0.000000e+00> : vector<2x8x8xf32>
    %115 = tpu.matmul %98, %106, %cst_87 {dimension_numbers = #tpu.dot_dimension_numbers<[2], [2], [1], [1], [0, 0, 0, 1, 1, 1], [0], [0]>} : vector<2x8x8xf32>, vector<2x8x8xf32>, vector<2x8x8xf32> -> vector<2x8x8xf32>
    "tpu.trace_stop"() : () -> ()
    %cst_88 = arith.constant 0.353553385 : f32
    %116 = vector.broadcast %cst_88 : f32 to vector<2x8x8xf32>
    %117 = arith.mulf %115, %116 : vector<2x8x8xf32>
    %cst_89 = arith.constant dense<0xFF800000> : vector<2x8xf32>
    %118 = vector.multi_reduction <maximumf>, %117, %cst_89 [2] : vector<2x8x8xf32> to vector<2x8xf32>
    %119 = vector.shape_cast %118 : vector<2x8xf32> to vector<2x8x1xf32>
    %120 = vector.broadcast %119 : vector<2x8x1xf32> to vector<2x8x8xf32>
    %121 = arith.subf %117, %120 : vector<2x8x8xf32>
    %122 = math.exp %121 : vector<2x8x8xf32>
    %cst_90 = arith.constant dense<0.000000e+00> : vector<2x8xf32>
    %123 = vector.multi_reduction <add>, %122, %cst_90 [2] : vector<2x8x8xf32> to vector<2x8xf32>
    %124 = vector.shape_cast %123 : vector<2x8xf32> to vector<2x8x1xf32>
    %125 = vector.broadcast %124 : vector<2x8x1xf32> to vector<2x8x8xf32>
    %126 = arith.divf %122, %125 : vector<2x8x8xf32>
    "tpu.trace_start"() <{level = 10 : i32, message = "bqk,bkd->bqd"}> : () -> ()
    %cst_91 = arith.constant dense<0.000000e+00> : vector<2x8x8xf32>
    %127 = tpu.matmul %126, %114, %cst_91 {dimension_numbers = #tpu.dot_dimension_numbers<[2], [1], [1], [2], [0, 0, 0, 1, 1, 2], [0], [0]>} : vector<2x8x8xf32>, vector<2x8x8xf32>, vector<2x8x8xf32> -> vector<2x8x8xf32>
    "tpu.trace_stop"() : () -> ()
    %128 = vector.shape_cast %127 : vector<2x8x8xf32> to vector<16x8xf32>
    %c2_92 = arith.constant 2 : index
    %c0_93 = arith.constant 0 : index
    %c0_94 = arith.constant 0 : index
    %129 = vector.load %arg7[%c2_92, %c0_93, %c0_94] : memref<4x8x32xf32, #tpu.memory_space<vmem>>, vector<1x8x32xf32>
    %130 = vector.shape_cast %129 : vector<1x8x32xf32> to vector<8x32xf32>
    %cst_95 = arith.constant dense<0.000000e+00> : vector<16x32xf32>
    %131 = tpu.matmul %128, %130, %cst_95 {dimension_numbers = #tpu.dot_dimension_numbers<[1], [0], [0], [1], [0, 0, 1, 1], [], []>} : vector<16x8xf32>, vector<8x32xf32>, vector<16x32xf32> -> vector<16x32xf32>
    %132 = arith.addf %90, %131 : vector<16x32xf32>
    %c3 = arith.constant 3 : index
    %c0_96 = arith.constant 0 : index
    %c0_97 = arith.constant 0 : index
    %133 = vector.load %arg4[%c3, %c0_96, %c0_97] : memref<4x32x8xf32, #tpu.memory_space<vmem>>, vector<1x32x8xf32>
    %134 = vector.shape_cast %133 : vector<1x32x8xf32> to vector<32x8xf32>
    %cst_98 = arith.constant dense<0.000000e+00> : vector<16x8xf32>
    %135 = tpu.matmul %3, %134, %cst_98 {dimension_numbers = #tpu.dot_dimension_numbers<[1], [0], [0], [1], [0, 0, 1, 1], [], []>} : vector<16x32xf32>, vector<32x8xf32>, vector<16x8xf32> -> vector<16x8xf32>
    %c3_99 = arith.constant 3 : index
    %c0_100 = arith.constant 0 : index
    %c0_101 = arith.constant 0 : index
    %136 = vector.load %arg8[%c3_99, %c0_100, %c0_101] : memref<4x1x8xf32, #tpu.memory_space<vmem>>, vector<1x1x8xf32>
    %137 = vector.shape_cast %136 : vector<1x1x8xf32> to vector<1x8xf32>
    %138 = vector.broadcast %137 : vector<1x8xf32> to vector<16x8xf32>
    %139 = arith.addf %135, %138 : vector<16x8xf32>
    %140 = vector.shape_cast %139 : vector<16x8xf32> to vector<2x8x8xf32>
    %c3_102 = arith.constant 3 : index
    %c0_103 = arith.constant 0 : index
    %c0_104 = arith.constant 0 : index
    %141 = vector.load %arg5[%c3_102, %c0_103, %c0_104] : memref<4x32x8xf32, #tpu.memory_space<vmem>>, vector<1x32x8xf32>
    %142 = vector.shape_cast %141 : vector<1x32x8xf32> to vector<32x8xf32>
    %cst_105 = arith.constant dense<0.000000e+00> : vector<16x8xf32>
    %143 = tpu.matmul %4, %142, %cst_105 {dimension_numbers = #tpu.dot_dimension_numbers<[1], [0], [0], [1], [0, 0, 1, 1], [], []>} : vector<16x32xf32>, vector<32x8xf32>, vector<16x8xf32> -> vector<16x8xf32>
    %c3_106 = arith.constant 3 : index
    %c0_107 = arith.constant 0 : index
    %c0_108 = arith.constant 0 : index
    %144 = vector.load %arg9[%c3_106, %c0_107, %c0_108] : memref<4x1x8xf32, #tpu.memory_space<vmem>>, vector<1x1x8xf32>
    %145 = vector.shape_cast %144 : vector<1x1x8xf32> to vector<1x8xf32>
    %146 = vector.broadcast %145 : vector<1x8xf32> to vector<16x8xf32>
    %147 = arith.addf %143, %146 : vector<16x8xf32>
    %148 = vector.shape_cast %147 : vector<16x8xf32> to vector<2x8x8xf32>
    %c3_109 = arith.constant 3 : index
    %c0_110 = arith.constant 0 : index
    %c0_111 = arith.constant 0 : index
    %149 = vector.load %arg6[%c3_109, %c0_110, %c0_111] : memref<4x32x8xf32, #tpu.memory_space<vmem>>, vector<1x32x8xf32>
    %150 = vector.shape_cast %149 : vector<1x32x8xf32> to vector<32x8xf32>
    %cst_112 = arith.constant dense<0.000000e+00> : vector<16x8xf32>
    %151 = tpu.matmul %5, %150, %cst_112 {dimension_numbers = #tpu.dot_dimension_numbers<[1], [0], [0], [1], [0, 0, 1, 1], [], []>} : vector<16x32xf32>, vector<32x8xf32>, vector<16x8xf32> -> vector<16x8xf32>
    %c3_113 = arith.constant 3 : index
    %c0_114 = arith.constant 0 : index
    %c0_115 = arith.constant 0 : index
    %152 = vector.load %arg10[%c3_113, %c0_114, %c0_115] : memref<4x1x8xf32, #tpu.memory_space<vmem>>, vector<1x1x8xf32>
    %153 = vector.shape_cast %152 : vector<1x1x8xf32> to vector<1x8xf32>
    %154 = vector.broadcast %153 : vector<1x8xf32> to vector<16x8xf32>
    %155 = arith.addf %151, %154 : vector<16x8xf32>
    %156 = vector.shape_cast %155 : vector<16x8xf32> to vector<2x8x8xf32>
    "tpu.trace_start"() <{level = 10 : i32, message = "bqd,bkd->bqk"}> : () -> ()
    %cst_116 = arith.constant dense<0.000000e+00> : vector<2x8x8xf32>
    %157 = tpu.matmul %140, %148, %cst_116 {dimension_numbers = #tpu.dot_dimension_numbers<[2], [2], [1], [1], [0, 0, 0, 1, 1, 1], [0], [0]>} : vector<2x8x8xf32>, vector<2x8x8xf32>, vector<2x8x8xf32> -> vector<2x8x8xf32>
    "tpu.trace_stop"() : () -> ()
    %cst_117 = arith.constant 0.353553385 : f32
    %158 = vector.broadcast %cst_117 : f32 to vector<2x8x8xf32>
    %159 = arith.mulf %157, %158 : vector<2x8x8xf32>
    %cst_118 = arith.constant dense<0xFF800000> : vector<2x8xf32>
    %160 = vector.multi_reduction <maximumf>, %159, %cst_118 [2] : vector<2x8x8xf32> to vector<2x8xf32>
    %161 = vector.shape_cast %160 : vector<2x8xf32> to vector<2x8x1xf32>
    %162 = vector.broadcast %161 : vector<2x8x1xf32> to vector<2x8x8xf32>
    %163 = arith.subf %159, %162 : vector<2x8x8xf32>
    %164 = math.exp %163 : vector<2x8x8xf32>
    %cst_119 = arith.constant dense<0.000000e+00> : vector<2x8xf32>
    %165 = vector.multi_reduction <add>, %164, %cst_119 [2] : vector<2x8x8xf32> to vector<2x8xf32>
    %166 = vector.shape_cast %165 : vector<2x8xf32> to vector<2x8x1xf32>
    %167 = vector.broadcast %166 : vector<2x8x1xf32> to vector<2x8x8xf32>
    %168 = arith.divf %164, %167 : vector<2x8x8xf32>
    "tpu.trace_start"() <{level = 10 : i32, message = "bqk,bkd->bqd"}> : () -> ()
    %cst_120 = arith.constant dense<0.000000e+00> : vector<2x8x8xf32>
    %169 = tpu.matmul %168, %156, %cst_120 {dimension_numbers = #tpu.dot_dimension_numbers<[2], [1], [1], [2], [0, 0, 0, 1, 1, 2], [0], [0]>} : vector<2x8x8xf32>, vector<2x8x8xf32>, vector<2x8x8xf32> -> vector<2x8x8xf32>
    "tpu.trace_stop"() : () -> ()
    %170 = vector.shape_cast %169 : vector<2x8x8xf32> to vector<16x8xf32>
    %c3_121 = arith.constant 3 : index
    %c0_122 = arith.constant 0 : index
    %c0_123 = arith.constant 0 : index
    %171 = vector.load %arg7[%c3_121, %c0_122, %c0_123] : memref<4x8x32xf32, #tpu.memory_space<vmem>>, vector<1x8x32xf32>
    %172 = vector.shape_cast %171 : vector<1x8x32xf32> to vector<8x32xf32>
    %cst_124 = arith.constant dense<0.000000e+00> : vector<16x32xf32>
    %173 = tpu.matmul %170, %172, %cst_124 {dimension_numbers = #tpu.dot_dimension_numbers<[1], [0], [0], [1], [0, 0, 1, 1], [], []>} : vector<16x8xf32>, vector<8x32xf32>, vector<16x32xf32> -> vector<16x32xf32>
    %174 = arith.addf %132, %173 : vector<16x32xf32>
    %c0_125 = arith.constant 0 : index
    %c0_126 = arith.constant 0 : index
    %175 = vector.load %arg11[%c0_125, %c0_126] : memref<1x32xf32, #tpu.memory_space<vmem>>, vector<1x32xf32>
    %176 = vector.broadcast %175 : vector<1x32xf32> to vector<16x32xf32>
    %177 = arith.addf %174, %176 : vector<16x32xf32>
    %178 = arith.addf %177, %3 : vector<16x32xf32>
    %cst_127 = arith.constant dense<0.000000e+00> : vector<16xf32>
    %179 = vector.multi_reduction <add>, %178, %cst_127 [1] : vector<16x32xf32> to vector<16xf32>
    %180 = vector.shape_cast %179 : vector<16xf32> to vector<16x1xf32>
    %cst_128 = arith.constant 3.200000e+01 : f32
    %181 = vector.broadcast %cst_128 : f32 to vector<16x1xf32>
    %182 = arith.divf %180, %181 : vector<16x1xf32>
    %183 = vector.broadcast %182 : vector<16x1xf32> to vector<16x32xf32>
    %184 = arith.subf %178, %183 : vector<16x32xf32>
    %185 = arith.mulf %184, %184 : vector<16x32xf32>
    %cst_129 = arith.constant dense<0.000000e+00> : vector<16xf32>
    %186 = vector.multi_reduction <add>, %185, %cst_129 [1] : vector<16x32xf32> to vector<16xf32>
    %187 = vector.shape_cast %186 : vector<16xf32> to vector<16x1xf32>
    %cst_130 = arith.constant 3.200000e+01 : f32
    %188 = vector.broadcast %cst_130 : f32 to vector<16x1xf32>
    %189 = arith.divf %187, %188 : vector<16x1xf32>
    %190 = vector.broadcast %182 : vector<16x1xf32> to vector<16x32xf32>
    %191 = arith.subf %178, %190 : vector<16x32xf32>
    %cst_131 = arith.constant 9.99999974E-6 : f32
    %192 = vector.broadcast %cst_131 : f32 to vector<16x1xf32>
    %193 = arith.addf %189, %192 : vector<16x1xf32>
    %194 = math.rsqrt %193 : vector<16x1xf32>
    %195 = vector.broadcast %194 : vector<16x1xf32> to vector<16x32xf32>
    %196 = arith.mulf %191, %195 : vector<16x32xf32>
    %c0_132 = arith.constant 0 : index
    %c0_133 = arith.constant 0 : index
    %197 = vector.load %arg12[%c0_132, %c0_133] : memref<1x32xf32, #tpu.memory_space<vmem>>, vector<1x32xf32>
    %198 = vector.broadcast %197 : vector<1x32xf32> to vector<16x32xf32>
    %199 = arith.mulf %196, %198 : vector<16x32xf32>
    %c0_134 = arith.constant 0 : index
    %c0_135 = arith.constant 0 : index
    %200 = vector.load %arg13[%c0_134, %c0_135] : memref<1x32xf32, #tpu.memory_space<vmem>>, vector<1x32xf32>
    %201 = vector.broadcast %200 : vector<1x32xf32> to vector<16x32xf32>
    %202 = arith.addf %199, %201 : vector<16x32xf32>
    %203 = vector.shape_cast %202 : vector<16x32xf32> to vector<2x8x32xf32>
    %c0_136 = arith.constant 0 : index
    %c0_137 = arith.constant 0 : index
    %c0_138 = arith.constant 0 : index
    %204 = vector.load %arg14[%c0_136, %c0_137, %c0_138] : memref<2x8x32xf32, #tpu.memory_space<vmem>>, vector<2x8x32xf32>
    tpu.vector_store %arg14[%c0_136, %c0_137, %c0_138], %203 {strides = array<i32>} : memref<2x8x32xf32, #tpu.memory_space<vmem>>, vector<2x8x32xf32>,
    return
  }
  func.func @transform_0(%arg0: i32) -> (i32, i32, i32) {
    %c0_i32 = arith.constant 0 : i32
    %c0_i32_0 = arith.constant 0 : i32
    %c0_i32_1 = arith.constant 0 : i32
    return %arg0, %c0_i32, %c0_i32_0 : i32, i32, i32
  }
  func.func @transform_1(%arg0: i32) -> (i32, i32, i32) {
    %c0_i32 = arith.constant 0 : i32
    %c0_i32_0 = arith.constant 0 : i32
    %c0_i32_1 = arith.constant 0 : i32
    return %arg0, %c0_i32, %c0_i32_0 : i32, i32, i32
  }
  func.func @transform_2(%arg0: i32) -> (i32, i32, i32) {
    %c0_i32 = arith.constant 0 : i32
    %c0_i32_0 = arith.constant 0 : i32
    %c0_i32_1 = arith.constant 0 : i32
    return %arg0, %c0_i32, %c0_i32_0 : i32, i32, i32
  }
  func.func @transform_3(%arg0: i32) -> (i32, i32, i32) {
    %c0_i32 = arith.constant 0 : i32
    %c0_i32_0 = arith.constant 0 : i32
    %c0_i32_1 = arith.constant 0 : i32
    %c0_i32_2 = arith.constant 0 : i32
    return %c0_i32, %c0_i32_0, %c0_i32_1 : i32, i32, i32
  }
  func.func @transform_4(%arg0: i32) -> (i32, i32, i32) {
    %c0_i32 = arith.constant 0 : i32
    %c0_i32_0 = arith.constant 0 : i32
    %c0_i32_1 = arith.constant 0 : i32
    %c0_i32_2 = arith.constant 0 : i32
    return %c0_i32, %c0_i32_0, %c0_i32_1 : i32, i32, i32
  }
  func.func @transform_5(%arg0: i32) -> (i32, i32, i32) {
    %c0_i32 = arith.constant 0 : i32
    %c0_i32_0 = arith.constant 0 : i32
    %c0_i32_1 = arith.constant 0 : i32
    %c0_i32_2 = arith.constant 0 : i32
    return %c0_i32, %c0_i32_0, %c0_i32_1 : i32, i32, i32
  }
  func.func @transform_6(%arg0: i32) -> (i32, i32, i32) {
    %c0_i32 = arith.constant 0 : i32
    %c0_i32_0 = arith.constant 0 : i32
    %c0_i32_1 = arith.constant 0 : i32
    %c0_i32_2 = arith.constant 0 : i32
    return %c0_i32, %c0_i32_0, %c0_i32_1 : i32, i32, i32
  }
  func.func @transform_7(%arg0: i32) -> (i32, i32, i32) {
    %c0_i32 = arith.constant 0 : i32
    %c0_i32_0 = arith.constant 0 : i32
    %c0_i32_1 = arith.constant 0 : i32
    %c0_i32_2 = arith.constant 0 : i32
    return %c0_i32, %c0_i32_0, %c0_i32_1 : i32, i32, i32
  }
  func.func @transform_8(%arg0: i32) -> (i32, i32, i32) {
    %c0_i32 = arith.constant 0 : i32
    %c0_i32_0 = arith.constant 0 : i32
    %c0_i32_1 = arith.constant 0 : i32
    %c0_i32_2 = arith.constant 0 : i32
    return %c0_i32, %c0_i32_0, %c0_i32_1 : i32, i32, i32
  }
  func.func @transform_9(%arg0: i32) -> (i32, i32, i32) {
    %c0_i32 = arith.constant 0 : i32
    %c0_i32_0 = arith.constant 0 : i32
    %c0_i32_1 = arith.constant 0 : i32
    %c0_i32_2 = arith.constant 0 : i32
    return %c0_i32, %c0_i32_0, %c0_i32_1 : i32, i32, i32
  }
  func.func @transform_10(%arg0: i32) -> (i32, i32) {
    %c0_i32 = arith.constant 0 : i32
    %c0_i32_0 = arith.constant 0 : i32
    %c0_i32_1 = arith.constant 0 : i32
    return %c0_i32, %c0_i32_0 : i32, i32
  }
  func.func @transform_11(%arg0: i32) -> (i32, i32) {
    %c0_i32 = arith.constant 0 : i32
    %c0_i32_0 = arith.constant 0 : i32
    %c0_i32_1 = arith.constant 0 : i32
    return %c0_i32, %c0_i32_0 : i32, i32
  }
  func.func @transform_12(%arg0: i32) -> (i32, i32) {
    %c0_i32 = arith.constant 0 : i32
    %c0_i32_0 = arith.constant 0 : i32
    %c0_i32_1 = arith.constant 0 : i32
    return %c0_i32, %c0_i32_0 : i32, i32
  }
  func.func @transform_13(%arg0: i32) -> (i32, i32, i32) {
    %c0_i32 = arith.constant 0 : i32
    %c0_i32_0 = arith.constant 0 : i32
    %c0_i32_1 = arith.constant 0 : i32
    return %arg0, %c0_i32, %c0_i32_0 : i32, i32, i32
  }
}

</mosaic_0001>

<bundles_post_ra>
// kernel: tpu_custom_call.1
= control target key start
LH: loop header
LB: loop body
LE: loop exit
PB: predicated region body
PF: predicated region fallthrough
CT: control target
= control target key end

     0   :  { %vm59_vm0 = vcmask 261120   ;;  %s1896_s0 = inlined_call_operand.vmem [shape: f32[2,8,32], index: 0, kind: input, shape index: {}]   ;;  %s1897_s1 = inlined_call_operand.vmem [shape: f32[2,8,32], index: 1, kind: input, shape index: {}]   ;;  %s1898_s2 = inlined_call_operand.vmem [shape: f32[2,8,32], index: 2, kind: input, shape index: {}]   ;;  %s1899_s3 = inlined_call_operand.vmem [shape: f32[4,32,8], index: 3, kind: input, shape index: {}]   ;;  %s1900_s4 = inlined_call_operand.vmem [shape: f32[4,32,8], index: 4, kind: input, shape index: {}]   ;;  %s1901_s5 = inlined_call_operand.vmem [shape: f32[4,32,8], index: 5, kind: input, shape index: {}]   ;;  %s1902_s6 = inlined_call_operand.vmem [shape: f32[4,8,32], index: 6, kind: input, shape index: {}]   ;;  %s1903_s7 = inlined_call_operand.vmem [shape: f32[4,1,8], index: 7, kind: input, shape index: {}]   ;;  %s1904_s8 = inlined_call_operand.vmem [shape: f32[4,1,8], index: 8, kind: input, shape index: {}]   ;;  %s1905_s9 = inlined_call_operand.vmem [shape: f32[4,1,8], index: 9, kind: input, shape index: {}]   ;;  %s1906_s10 = inlined_call_operand.vmem [shape: f32[1,32], index: 10, kind: input, shape index: {}]   ;;  %s1907_s11 = inlined_call_operand.vmem [shape: f32[1,32], index: 11, kind: input, shape index: {}]   ;;  %s1908_s12 = inlined_call_operand.vmem [shape: f32[1,32], index: 12, kind: input, shape index: {}]   ;;  %s1909_s13 = inlined_call_operand.hbm [shape: f32[2,8,32], index: 13, kind: output, shape index: {}]  }
   0x1   :  { %v92_v0 = vld [vmem:[%s1900_s4 + $0x18] sm:$0xff]  ;;  %v91_v1 = vld [vmem:[%s1900_s4 + $0x10] sm:$0xff]  ;;  %v90_v4 = vld [vmem:[%s1900_s4 + $0x8] sm:$0xff] }
   0x2   :  { %v54_v2 = vld [vmem:[%s1899_s3 + $0x18] sm:$0xff]  ;;  %115 = vmatpush.msra.mxu1 %v92_v0  ;;  %1375 = vmatpush.msra.mxu2 %v92_v0  ;;  %v53_v3 = vld [vmem:[%s1899_s3 + $0x10] sm:$0xff]  ;;  %v89_v5 = vld [vmem:[%s1900_s4] sm:$0xff] }
   0x3   :  { %78 = vmatpush.msra.mxu0 %v54_v2  ;;  %v52_v6 = vld [vmem:[%s1899_s3 + $0x8] sm:$0xff]  ;;  %v1560_v7 = vld [vmem:[%s1897_s1] sm:$0xff] }
   0x4   :  { %116 = vmatpush.msra.mxu1 %v91_v1  ;;  %1376 = vmatpush.msra.mxu2 %v91_v1  ;;  %v51_v8 = vld [vmem:[%s1899_s3] sm:$0xff]  ;;  %v1568_v9 = vld [vmem:[%s1897_s1 + $0x8] sm:$0xff] }
   0x5   :  { %79 = vmatpush.msra.mxu0 %v53_v3  ;;  %v1573_v10 = vld [vmem:[%s1896_s0] sm:$0xff] }
   0x6   :  { %117 = vmatpush.msra.mxu1 %v90_v4  ;;  %1377 = vmatpush.msra.mxu2 %v90_v4 }
   0x7   :  { %80 = vmatpush.msra.mxu0 %v52_v6 }
   0x8   :  { %118 = vmatpush.msra.mxu1 %v89_v5  ;;  %1378 = vmatpush.msra.mxu2 %v89_v5 }
   0x9   :  { %1273 = vmatmul.msk.f32.vlgmr.msra.gmra.mxu1 %vm59_vm0, %v1560_v7  ;;  %81 = vmatpush.msra.mxu0 %v51_v8 }
   0xa   :  { %1274 = vmatmul.msk.f32.vlgmr.msra.gmra.mxu2 %vm59_vm0, %v1568_v9  ;;  %1271 = vmatmul.msk.f32.vlgmr.msra.gmra.mxu0 %vm59_vm0, %v1573_v10 }
   0xb   :  { %18 = vsyncpa [#allocation3], 0  ;;  %v1584_v11 = vld [vmem:[%s1896_s0 + $0x8] sm:$0xff]  ;;  %v1383_v12 = vld [vmem:[%s1904_s8] ss:$0 sm:$0xff]  ;;  %vm163_vm1 = vcmask 64512  }
   0xc   :  { %v1384_v13 = vld [vmem:[%s1903_s7] ss:$0 sm:$0xff]  ;;  %v129_v28 = vld [vmem:[%s1901_s5 + $0x18] sm:$0xff]  ;;  %v128_v29 = vld [vmem:[%s1901_s5 + $0x10] sm:$0xff]  ;;  %s1259_s1 = sshll.u32 %s1909_s13, 4  ;;  %s1260_s1 = int_to_ptr.hbm [resolvable:$true] %s1259_s1 }
   0xd   :  { %152 = vmatpush.msrb.mxu2 %v129_v28  ;;  %v127_v30 = vld [vmem:[%s1901_s5 + $0x8] sm:$0xff]  ;;  %v126_v31 = vld [vmem:[%s1901_s5] sm:$0xff]  ;;  %v1293_v33 = vld [vmem:[%s1900_s4 + $0x38] sm:$0xff] }
   0xe   :  { %v1615_v32 = vld [vmem:[%s1898_s2] sm:$0xff]  ;;  %v1625_v34 = vld [vmem:[%s1898_s2 + $0x8] sm:$0xff]  ;;  %v1292_v35 = vld [vmem:[%s1900_s4 + $0x30] sm:$0xff] }
   0xf   :  { %153 = vmatpush.msrb.mxu2 %v128_v29  ;;  %v1291_v36 = vld [vmem:[%s1900_s4 + $0x28] sm:$0xff]  ;;  %v1286_v37 = vld [vmem:[%s1899_s3 + $0x38] sm:$0xff]  ;;  %v1285_v38 = vld [vmem:[%s1899_s3 + $0x30] sm:$0xff] }
  0x10   :  { %v1290_v39 = vld [vmem:[%s1900_s4 + $0x20] sm:$0xff]  ;;  %335 = vmatpush.msrb.mxu1 %v1286_v37  ;;  %v1284_v40 = vld [vmem:[%s1899_s3 + $0x28] sm:$0xff] }
  0x11   :  { %154 = vmatpush.msrb.mxu2 %v127_v30  ;;  %v1283_v41 = vld [vmem:[%s1899_s3 + $0x20] sm:$0xff] }
  0x12   :  { %1272 = vmatmul.msk.f32.gmra.mxu0 %vm59_vm0, %v1584_v11  ;;  %336 = vmatpush.msrb.mxu1 %v1285_v38  ;;  %v1385_v52 = vld [vmem:[%s1905_s9] ss:$0 sm:$0xff]  ;;  %v1386_v57 = vld [vmem:[%s1904_s8 + $0x1] ss:$0 sm:$0xff] }
  0x13   :  { %155 = vmatpush.msrb.mxu2 %v126_v31  ;;  %v312_v31 = vld [vmem:[%s1902_s6] sm:$0xff] }
  0x14   :  { %1275 = vmatmul.msk.f32.vlgmr.msrb.gmra.mxu2 %vm59_vm0, %v1615_v32  ;;  %337 = vmatpush.msrb.mxu1 %v1284_v40 }
  0x15   :  { %368 = vmatpush.msra.mxu2 %v1293_v33 }
  0x16   :  { %338 = vmatpush.msrb.mxu1 %v1283_v41 }
  0x17   :  { %369 = vmatpush.msra.mxu2 %v1292_v35  ;;  %1288 = vmatmul.msk.f32.vlgmr.msrb.gmra.mxu1 %vm59_vm0, %v1573_v10 }
  0x19   :  { %370 = vmatpush.msra.mxu2 %v1291_v36 }
  0x1b   :  { %371 = vmatpush.msra.mxu2 %v1290_v39 }
  0x1c   :  { %1276 = vmatmul.msk.f32.gmra.mxu2 %vm59_vm0, %v1625_v34 }
  0x1f   :  { %1289 = vmatmul.msk.f32.gmra.mxu1 %vm59_vm0, %v1584_v11 }
  0x24   :  { %1295 = vmatmul.msk.f32.vlgmr.msra.gmra.mxu2 %vm59_vm0, %v1560_v7 }
  0x2c   :  { %1296 = vmatmul.msk.f32.gmra.mxu2 %vm59_vm0, %v1568_v9 }
  0x86   :  { %v120_v14 = vpop.f32.mrf.mxu1 }
  0x87   :  { %v121_v15 = vadd.f32 %v1383_v12, %v120_v14  ;;  %v83_v16 = vpop.f32.mrf.mxu0 }
  0x88   :  { %v84_v17 = vadd.f32 %v1384_v13, %v83_v16 }
  0x89   :  { %1277 = vmatpush.xpose.msk.msra.mxu3 %vm163_vm1, %v121_v15 }
  0x8c   :  { %1278 = vmatmul.msk.f32.vlgmr.msra.gmra.mxu3 %vm163_vm1, %v84_v17 }
  0x8d   :  { %v123_v18 = vpop.f32.mrf.mxu2 }
  0x8e   :  { %v124_v19 = vadd.f32 %v1383_v12, %v123_v18 }
  0x8f   :  { %v86_v20 = vpop.f32.mrf.mxu0 }
  0x90   :  { %v87_v21 = vadd.f32 %v1384_v13, %v86_v20  ;;  %1279 = vmatpush.xpose.msk.msrb.mxu3 %vm163_vm1, %v124_v19 }
  0x94   :  { %1280 = vmatmul.msk.f32.vlgmr.msrb.gmra.mxu3 %vm163_vm1, %v87_v21 }
  0x97   :  { %v157_v53 = vpop.f32.mrf.mxu2 }
  0x98   :  { %v158_v54 = vadd.f32 %v1385_v52, %v157_v53 }
  0x9a   :  { %284 = vmatpush.msra.mxu3 %v158_v54 }
  0x9f   :  { %v160_v55 = vpop.f32.mrf.mxu2 }
  0xa0   :  { %v161_v56 = vadd.f32 %v1385_v52, %v160_v55 }
  0xa2   :  { %307 = vmatpush.msrb.mxu0 %v161_v56  ;;  %v1388_v56 = vld [vmem:[%s1905_s9 + $0x1] ss:$0 sm:$0xff] }
  0xa7   :  { %v373_v58 = vpop.f32.mrf.mxu2 }
  0xa8   :  { %v374_v59 = vadd.f32 %v1386_v57, %v373_v58 }
  0xaa   :  { %1304 = vmatpush.xpose.msk.msra.mxu0 %vm163_vm1, %v374_v59 }
  0xaf   :  { %v376_v20 = vpop.f32.mrf.mxu2 }
 0x10f   :  { %v187_v22 = vpop.f32.mrf.mxu3 }
 0x110   :  { %v216_v23 = vmul.f32 0.35355338, %v187_v22 }
 0x112   :  { %v218_v24 = vsel %vm163_vm1, %v216_v23, -inf }
 0x113   :  { %219 = vmax.xlane.f32.xlu1 %v218_v24  ;;  %v377_v24 = vadd.f32 %v1386_v57, %v376_v20 }
 0x117   :  { %v213_v25 = vpop.f32.mrf.mxu3 }
 0x118   :  { %v217_v26 = vmul.f32 0.35355338, %v213_v25 }
 0x11a   :  { %v221_v27 = vsel %vm163_vm1, %v217_v26, -inf }
 0x11b   :  { %222 = vmax.xlane.f32.xlu0 %v221_v27  ;;  %v1387_v27 = vld [vmem:[%s1903_s7 + $0x1] ss:$0 sm:$0xff] }
 0x186   :  { %v220_v42 = vpop.xlane.xlu1 %219 }
 0x187   :  { %v224_v43 = vsub.f32 %v216_v23, %v220_v42  ;;  %v1300_v42 = vld [vmem:[%s1901_s5 + $0x38] sm:$0xff] }
 0x188   :  { %401 = vmatpush.msrb.mxu3 %v1300_v42 }
 0x189   :  { %v226_v44 = vmul.f32 1.442695, %v224_v43  ;;  %v1299_v43 = vld [vmem:[%s1901_s5 + $0x30] sm:$0xff] }
 0x18a   :  { %402 = vmatpush.msrb.mxu3 %v1299_v43 }
 0x18b   :  { %1398 = vpow2.f32 %v226_v44  ;;  %v1298_v44 = vld [vmem:[%s1901_s5 + $0x28] sm:$0xff] }
 0x18c   :  { %403 = vmatpush.msrb.mxu3 %v1298_v44 }
 0x18e   :  { %v223_v45 = vpop.xlane.xlu0 %222 }
 0x18f   :  { %v225_v46 = vsub.f32 %v217_v26, %v223_v45  ;;  %v340_v26 = vpop.f32.mrf.mxu1  ;;  %v1297_v45 = vld [vmem:[%s1901_s5 + $0x20] sm:$0xff] }
 0x190   :  { %v341_v28 = vadd.f32 %v1387_v27, %v340_v26  ;;  %404 = vmatpush.msrb.mxu3 %v1297_v45 }
 0x191   :  { %v1399_v47 = vpop.eup %1398  ;;  %v228_v48 = vmul.f32 1.442695, %v225_v46 }
 0x192   :  { %v230_v49 = vsel %vm163_vm1, %v1399_v47, 0.0 }
 0x193   :  { %1400 = vpow2.f32 %v228_v48  ;;  %231 = vadd.xlane.f32.xlu1 %v230_v49 }
 0x197   :  { %v343_v29 = vpop.f32.mrf.mxu1 }
 0x198   :  { %v344_v30 = vadd.f32 %v1387_v27, %v343_v29 }
 0x199   :  { %v1401_v50 = vpop.eup %1400 }
 0x19a   :  { %v233_v51 = vsel %vm163_vm1, %v1401_v50, 0.0 }
 0x19b   :  { %234 = vadd.xlane.f32.xlu0 %v233_v51 }
 0x206   :  { %v232_v60 = vpop.xlane.xlu1 %231 }
 0x207   :  { %1402 = vrcp.f32 %v232_v60  ;;  %v247_v1 = vand.u32 2147483648, %v232_v60  ;;  %v245_v3 = vand.u32 2147483647, %v232_v60  ;;  %vm241_vm3 = vweird.f32 %v232_v60 }
 0x209   :  { %v248_v6 = vor.u32 1.1754944e-38, %v247_v1  ;;  %vm246_vm5 = vcmp.eq.f32.partialorder %v245_v3, 8.507059e+37  ;;  %v1318_v1 = vld [vmem:[%s1899_s3 + $0x58] sm:$0xff]  ;;  %v1316_v3 = vld [vmem:[%s1899_s3 + $0x48] sm:$0xff] }
 0x20d   :  { %v1403_v61 = vpop.eup %1402 }
 0x20e   :  { %v237_v62 = vmul.f32 %v1403_v61, %v232_v60  ;;  %v235_v63 = vpop.xlane.xlu0 %234  ;;  %vm242_vm2 = vweird.f32 %v1403_v61 }
 0x20f   :  { %1404 = vrcp.f32 %v235_v63  ;;  %vm243_vm4 = vmor %vm241_vm3, %vm242_vm2  ;;  %v262_v16 = vand.u32 2147483648, %v235_v63  ;;  %v260_v18 = vand.u32 2147483647, %v235_v63  ;;  %vm256_vm7 = vweird.f32 %v235_v63 }
 0x210   :  { %v238_v0 = vsub.f32 1.0, %v237_v62  ;;  %v1324_v62 = vld [vmem:[%s1900_s4 + $0x50] sm:$0xff] }
 0x211   :  { %v263_v21 = vor.u32 1.1754944e-38, %v262_v16  ;;  %vm261_vm9 = vcmp.eq.f32.partialorder %v260_v18, 8.507059e+37 }
 0x212   :  { %v239_v2 = vmul.f32 %v1403_v61, %v238_v0  ;;  %v1322_v0 = vld [vmem:[%s1900_s4 + $0x40] sm:$0xff] }
 0x214   :  { %v240_v4 = vadd.f32 %v1403_v61, %v239_v2  ;;  %v1317_v2 = vld [vmem:[%s1899_s3 + $0x50] sm:$0xff] }
 0x215   :  { %v1405_v5 = vpop.eup %1404 }
 0x216   :  { %v244_v8 = vsel %vm243_vm4, %v1403_v61, %v240_v4  ;;  %v252_v12 = vmul.f32 %v1405_v5, %v235_v63  ;;  %vm257_vm6 = vweird.f32 %v1405_v5  ;;  %v1325_v61 = vld [vmem:[%s1900_s4 + $0x58] sm:$0xff]  ;;  %v1323_v63 = vld [vmem:[%s1900_s4 + $0x48] sm:$0xff] }
 0x217   :  { %v249_v13 = vsel %vm246_vm5, %v248_v6, %v244_v8  ;;  %vm258_vm8 = vmor %vm256_vm7, %vm257_vm6 }
 0x218   :  { %v253_v14 = vsub.f32 1.0, %v252_v12  ;;  %v250_v15 = vmul.f32 %v1399_v47, %v249_v13 }
 0x21a   :  { %v254_v17 = vmul.f32 %v1405_v5, %v253_v14  ;;  %1281 = vmatmul.msk.f32.vlgmr.msra.gmra.mxu3 %vm163_vm1, %v250_v15 }
 0x21c   :  { %v255_v19 = vadd.f32 %v1405_v5, %v254_v17 }
 0x21e   :  { %v259_v22 = vsel %vm258_vm8, %v1405_v5, %v255_v19  ;;  %v1315_v5 = vld [vmem:[%s1899_s3 + $0x40] sm:$0xff] }
 0x21f   :  { %v264_v23 = vsel %vm261_vm9, %v263_v21, %v259_v22 }
 0x220   :  { %v265_v25 = vmul.f32 %v1401_v50, %v264_v23 }
 0x222   :  { %1282 = vmatmul.msk.f32.vlgmr.msrb.gmra.mxu0 %vm163_vm1, %v265_v25  ;;  %1302 = vmatmul.msk.f32.vlgmr.msrb.gmra.mxu3 %vm59_vm0, %v1615_v32 }
 0x223   :  { %1306 = vmatpush.xpose.msk.msrb.mxu0 %vm163_vm1, %v377_v24 }
 0x22a   :  { %1305 = vmatmul.msk.f32.vlgmr.msra.gmra.mxu0 %vm163_vm1, %v341_v28  ;;  %1303 = vmatmul.msk.f32.gmra.mxu3 %vm59_vm0, %v1625_v34 }
 0x22b   :  { %612 = vmatpush.msra.mxu0 %v312_v31 }
 0x232   :  { %1307 = vmatmul.msk.f32.vlgmr.msrb.gmra.mxu0 %vm163_vm1, %v344_v30 }
 0x29d   :  { %v286_v33 = vpop.f32.mrf.mxu3 }
 0x29e   :  { %1313 = vmatmul.msk.f32.vlgmr.msra.gmra.mxu0 %vm163_vm1, %v286_v33 }
 0x29f   :  { %v309_v35 = vpop.f32.mrf.mxu0 }
 0x2a5   :  { %v406_v57 = vpop.f32.mrf.mxu3 }
 0x2a6   :  { %1314 = vmatmul.msk.f32.gmra.mxu0 %vm163_vm1, %v309_v35  ;;  %v407_v58 = vadd.f32 %v1388_v56, %v406_v57  ;;  %v1310_v35 = vld [vmem:[%s1902_s6 + $0x8] sm:$0xff]  ;;  %v1331_v57 = vld [vmem:[%s1901_s5 + $0x50] sm:$0xff] }
 0x2a7   :  { %v435_v36 = vpop.f32.mrf.mxu0  ;;  %583 = vmatpush.msra.mxu3 %v1310_v35 }
 0x2a8   :  { %v464_v40 = vmul.f32 0.35355338, %v435_v36  ;;  %532 = vmatpush.msra.mxu1 %v407_v58  ;;  %v1330_v58 = vld [vmem:[%s1901_s5 + $0x48] sm:$0xff] }
 0x2aa   :  { %v466_v41 = vsel %vm163_vm1, %v464_v40, -inf  ;;  %642 = vmatpush.msrb.mxu1 %v1318_v1 }
 0x2ac   :  { %643 = vmatpush.msrb.mxu1 %v1317_v2 }
 0x2ad   :  { %v409_v59 = vpop.f32.mrf.mxu3 }
 0x2ae   :  { %v410_v60 = vadd.f32 %v1388_v56, %v409_v59  ;;  %644 = vmatpush.msrb.mxu1 %v1316_v3  ;;  %v1332_v56 = vld [vmem:[%s1901_s5 + $0x58] sm:$0xff]  ;;  %v1329_v59 = vld [vmem:[%s1901_s5 + $0x40] sm:$0xff] }
 0x2af   :  { %v461_v37 = vpop.f32.mrf.mxu0  ;;  %708 = vmatpush.msrb.mxu3 %v1332_v56 }
 0x2b0   :  { %v465_v38 = vmul.f32 0.35355338, %v461_v37  ;;  %555 = vmatpush.msrb.mxu2 %v410_v60  ;;  %645 = vmatpush.msrb.mxu1 %v1315_v5 }
 0x2b1   :  { %709 = vmatpush.msrb.mxu3 %v1331_v57 }
 0x2b2   :  { %v469_v39 = vsel %vm163_vm1, %v465_v38, -inf  ;;  %675 = vmatpush.msra.mxu2 %v1325_v61 }
 0x2b3   :  { %470 = vmax.xlane.f32.xlu2 %v469_v39  ;;  %v1390_v39 = vld [vmem:[%s1903_s7 + $0x2] ss:$0 sm:$0xff]  ;;  %710 = vmatpush.msrb.mxu3 %v1330_v58 }
 0x2b4   :  { %676 = vmatpush.msra.mxu2 %v1324_v62 }
 0x2b5   :  { %711 = vmatpush.msrb.mxu3 %v1329_v59 }
 0x2b6   :  { %677 = vmatpush.msra.mxu2 %v1323_v63 }
 0x2b8   :  { %678 = vmatpush.msra.mxu2 %v1322_v0 }
 0x2bb   :  { %467 = vmax.xlane.f32.xlu2 %v466_v41 }
 0x326   :  { %v471_v46 = vpop.xlane.xlu2 %470 }
 0x327   :  { %v473_v47 = vsub.f32 %v465_v38, %v471_v46  ;;  %v1389_v38 = vld [vmem:[%s1904_s8 + $0x2] ss:$0 sm:$0xff] }
 0x329   :  { %v476_v48 = vmul.f32 1.442695, %v473_v47 }
 0x32b   :  { %1406 = vpow2.f32 %v476_v48  ;;  %v1752_v48 = vpop.f32.mrf.mxu0 }
 0x32e   :  { %v468_v49 = vpop.xlane.xlu2 %467 }
 0x32f   :  { %v472_v50 = vsub.f32 %v464_v40, %v468_v49 }
 0x331   :  { %v1407_v51 = vpop.eup %1406  ;;  %v474_v52 = vmul.f32 1.442695, %v472_v50 }
 0x332   :  { %v481_v53 = vsel %vm163_vm1, %v1407_v51, 0.0 }
 0x333   :  { %1408 = vpow2.f32 %v474_v52  ;;  %482 = vadd.xlane.f32.xlu0 %v481_v53  ;;  %v1754_v49 = vpop.f32.mrf.mxu0 }
 0x339   :  { %v1409_v54 = vpop.eup %1408 }
 0x33a   :  { %v478_v55 = vsel %vm163_vm1, %v1409_v54, 0.0 }
 0x33b   :  { %479 = vadd.xlane.f32.xlu1 %v478_v55 }
 0x3a6   :  { %v483_v4 = vpop.xlane.xlu0 %482 }
 0x3a7   :  { %1410 = vrcp.f32 %v483_v4  ;;  %v510_v14 = vand.u32 2147483648, %v483_v4  ;;  %v508_v16 = vand.u32 2147483647, %v483_v4  ;;  %vm504_vm11 = vweird.f32 %v483_v4 }
 0x3a9   :  { %v511_v19 = vor.u32 1.1754944e-38, %v510_v14  ;;  %vm509_vm13 = vcmp.eq.f32.partialorder %v508_v16, 8.507059e+37  ;;  %v1354_v16 = vld [vmem:[%s1900_s4 + $0x70] sm:$0xff] }
 0x3ad   :  { %v1411_v6 = vpop.eup %1410 }
 0x3ae   :  { %v500_v8 = vmul.f32 %v1411_v6, %v483_v4  ;;  %v480_v12 = vpop.xlane.xlu1 %479  ;;  %vm505_vm10 = vweird.f32 %v1411_v6 }
 0x3af   :  { %1412 = vrcp.f32 %v480_v12  ;;  %vm506_vm12 = vmor %vm504_vm11, %vm505_vm10  ;;  %v495_v25 = vand.u32 2147483648, %v480_v12  ;;  %v493_v27 = vand.u32 2147483647, %v480_v12  ;;  %vm489_vm15 = vweird.f32 %v480_v12 }
 0x3b0   :  { %v501_v13 = vsub.f32 1.0, %v500_v8 }
 0x3b1   :  { %v496_v29 = vor.u32 1.1754944e-38, %v495_v25  ;;  %vm494_vm3 = vcmp.eq.f32.partialorder %v493_v27, 8.507059e+37 }
 0x3b2   :  { %v502_v15 = vmul.f32 %v1411_v6, %v501_v13 }
 0x3b4   :  { %v503_v17 = vadd.f32 %v1411_v6, %v502_v15  ;;  %v1355_v15 = vld [vmem:[%s1900_s4 + $0x78] sm:$0xff] }
 0x3b5   :  { %v1413_v18 = vpop.eup %1412 }
 0x3b6   :  { %v507_v20 = vsel %vm506_vm12, %v1411_v6, %v503_v17  ;;  %v485_v21 = vmul.f32 %v1413_v18, %v480_v12  ;;  %vm490_vm14 = vweird.f32 %v1413_v18  ;;  %v1391_v12 = vld [vmem:[%s1905_s9 + $0x2] ss:$0 sm:$0xff]  ;;  %v1348_v17 = vld [vmem:[%s1899_s3 + $0x78] sm:$0xff] }
 0x3b7   :  { %v512_v22 = vsel %vm509_vm13, %v511_v19, %v507_v20  ;;  %vm491_vm2 = vmor %vm489_vm15, %vm490_vm14  ;;  %v1347_v19 = vld [vmem:[%s1899_s3 + $0x70] sm:$0xff]  ;;  %v1352_v20 = vld [vmem:[%s1900_s4 + $0x60] sm:$0xff] }
 0x3b8   :  { %v486_v23 = vsub.f32 1.0, %v485_v21  ;;  %v513_v24 = vmul.f32 %v1407_v51, %v512_v22  ;;  %v1346_v22 = vld [vmem:[%s1899_s3 + $0x68] sm:$0xff] }
 0x3ba   :  { %v487_v26 = vmul.f32 %v1413_v18, %v486_v23  ;;  %1309 = vmatmul.msk.f32.vlgmr.msrb.gmra.mxu2 %vm163_vm1, %v513_v24  ;;  %v1345_v24 = vld [vmem:[%s1899_s3 + $0x60] sm:$0xff]  ;;  %s1465_s3 = smov 8  }
 0x3bc   :  { %v488_v28 = vadd.f32 %v1413_v18, %v487_v26 }
 0x3be   :  { %v492_v30 = vsel %vm491_vm2, %v1413_v18, %v488_v28  ;;  %v1353_v18 = vld [vmem:[%s1900_s4 + $0x68] sm:$0xff] }
 0x3bf   :  { %v497_v31 = vsel %vm494_vm3, %v496_v29, %v492_v30 }
 0x3c0   :  { %v498_v33 = vmul.f32 %v1409_v54, %v497_v31 }
 0x3c2   :  { %1308 = vmatmul.msk.f32.vlgmr.msra.gmra.mxu1 %vm163_vm1, %v498_v33  ;;  %1327 = vmatmul.msk.f32.vlgmr.msra.gmra.mxu2 %vm59_vm0, %v1560_v7 }
 0x3ca   :  { %1328 = vmatmul.msk.f32.gmra.mxu2 %vm59_vm0, %v1568_v9  ;;  %1320 = vmatmul.msk.f32.vlgmr.msrb.gmra.mxu1 %vm59_vm0, %v1573_v10 }
 0x3d2   :  { %1321 = vmatmul.msk.f32.gmra.mxu1 %vm59_vm0, %v1584_v11 }
 0x43d   :  { %v557_v36 = vpop.f32.mrf.mxu2 }
 0x43f   :  { %v534_v37 = vpop.f32.mrf.mxu1 }
 0x440   :  { %1311 = vmatmul.msk.f32.vlgmr.msra.gmra.mxu3 %vm163_vm1, %v534_v37 }
 0x441   :  { %955 = vmatpush.msra.mxu3 %v1355_v15 }
 0x443   :  { %956 = vmatpush.msra.mxu3 %v1354_v16 }
 0x445   :  { %v680_v40 = vpop.f32.mrf.mxu2  ;;  %957 = vmatpush.msra.mxu3 %v1353_v18 }
 0x446   :  { %v681_v41 = vadd.f32 %v1389_v38, %v680_v40 }
 0x447   :  { %v647_v42 = vpop.f32.mrf.mxu1  ;;  %958 = vmatpush.msra.mxu3 %v1352_v20 }
 0x448   :  { %1312 = vmatmul.msk.f32.gmra.mxu3 %vm163_vm1, %v557_v36  ;;  %v648_v43 = vadd.f32 %v1390_v39, %v647_v42  ;;  %1336 = vmatpush.xpose.msk.msrb.mxu0 %vm163_vm1, %v681_v41 }
 0x44b   :  { %1337 = vmatmul.msk.f32.vlgmr.msrb.gmra.mxu0 %vm163_vm1, %v648_v43 }
 0x44d   :  { %v683_v44 = vpop.f32.mrf.mxu2 }
 0x44e   :  { %v684_v45 = vadd.f32 %v1389_v38, %v683_v44 }
 0x44f   :  { %v650_v46 = vpop.f32.mrf.mxu1 }
 0x450   :  { %v651_v47 = vadd.f32 %v1390_v39, %v650_v46  ;;  %1338 = vmatpush.xpose.msk.msra.mxu1 %vm163_vm1, %v684_v45  ;;  %1334 = vmatmul.msk.f32.vlgmr.msrb.gmra.mxu3 %vm59_vm0, %v1615_v32 }
 0x453   :  { %1339 = vmatmul.msk.f32.vlgmr.msra.gmra.mxu1 %vm163_vm1, %v651_v47 }
 0x458   :  { %1335 = vmatmul.msk.f32.gmra.mxu3 %vm59_vm0, %v1625_v34 }
 0x460   :  { %1357 = vmatmul.msk.f32.vlgmr.msra.gmra.mxu3 %vm59_vm0, %v1560_v7 }
 0x468   :  { %1358 = vmatmul.msk.f32.gmra.mxu3 %vm59_vm0, %v1568_v9 }
 0x4c3   :  { %v1779_v6 = vpop.f32.mrf.mxu3 }
 0x4c8   :  { %v742_v50 = vpop.f32.mrf.mxu0 }
 0x4c9   :  { %v771_v51 = vmul.f32 0.35355338, %v742_v50 }
 0x4cb   :  { %v773_v52 = vsel %vm163_vm1, %v771_v51, -inf  ;;  %v1781_v8 = vpop.f32.mrf.mxu3 }
 0x4cc   :  { %774 = vmax.xlane.f32.xlu2 %v773_v52  ;;  %v1392_v52 = vld [vmem:[%s1904_s8 + $0x3] ss:$0 sm:$0xff] }
 0x4d0   :  { %v768_v53 = vpop.f32.mrf.mxu1 }
 0x4d1   :  { %v772_v54 = vmul.f32 0.35355338, %v768_v53 }
 0x4d3   :  { %v776_v55 = vsel %vm163_vm1, %v772_v54, -inf  ;;  %v713_v13 = vpop.f32.mrf.mxu3 }
 0x4d4   :  { %777 = vmax.xlane.f32.xlu0 %v776_v55  ;;  %v714_v14 = vadd.f32 %v1391_v12, %v713_v13 }
 0x4d6   :  { %839 = vmatpush.msrb.mxu2 %v714_v14 }
 0x4d8   :  { %922 = vmatpush.msra.mxu2 %v1348_v17 }
 0x4da   :  { %923 = vmatpush.msra.mxu2 %v1347_v19 }
 0x4db   :  { %v716_v21 = vpop.f32.mrf.mxu3 }
 0x4dc   :  { %v717_v23 = vadd.f32 %v1391_v12, %v716_v21  ;;  %924 = vmatpush.msra.mxu2 %v1346_v22 }
 0x4de   :  { %862 = vmatpush.msra.mxu0 %v717_v23  ;;  %925 = vmatpush.msra.mxu2 %v1345_v24 }
 0x4e3   :  { %v960_v53 = vpop.f32.mrf.mxu3 }
 0x4eb   :  { %v963_v55 = vpop.f32.mrf.mxu3 }
 0x4ec   :  { %v964_v56 = vadd.f32 %v1392_v52, %v963_v55 }
 0x53f   :  { %v775_v60 = vpop.xlane.xlu2 %774 }
 0x540   :  { %v779_v61 = vsub.f32 %v771_v51, %v775_v60  ;;  %v1342_v51 = vld [vmem:[%s1902_s6 + $0x10] sm:$0xff]  ;;  %v1393_v60 = vld [vmem:[%s1903_s7 + $0x3] ss:$0 sm:$0xff] }
 0x541   :  { %890 = vmatpush.msrb.mxu1 %v1342_v51 }
 0x542   :  { %v781_v62 = vmul.f32 1.442695, %v779_v61 }
 0x544   :  { %1414 = vpow2.f32 %v781_v62 }
 0x547   :  { %v778_v63 = vpop.xlane.xlu0 %777 }
 0x548   :  { %v780_v0 = vsub.f32 %v772_v54, %v778_v63  ;;  %v961_v54 = vadd.f32 %v1392_v52, %v960_v53 }
 0x54a   :  { %v1415_v1 = vpop.eup %1414  ;;  %v783_v2 = vmul.f32 1.442695, %v780_v0  ;;  %1366 = vmatpush.xpose.msk.msra.mxu1 %vm163_vm1, %v961_v54  ;;  %v615_v0 = vadd.f32 %v1752_v48, %v1779_v6  ;;  %v1362_v48 = vld [vmem:[%s1901_s5 + $0x78] sm:$0xff]  ;;  %v1360_v6 = vld [vmem:[%s1901_s5 + $0x68] sm:$0xff] }
 0x54b   :  { %v785_v3 = vsel %vm163_vm1, %v1415_v1, 0.0  ;;  %988 = vmatpush.msrb.mxu0 %v1362_v48 }
 0x54c   :  { %1416 = vpow2.f32 %v783_v2  ;;  %786 = vadd.xlane.f32.xlu1 %v785_v3  ;;  %v618_v3 = vadd.f32 %v1754_v49, %v1781_v8  ;;  %v1361_v49 = vld [vmem:[%s1901_s5 + $0x70] sm:$0xff]  ;;  %v1359_v8 = vld [vmem:[%s1901_s5 + $0x60] sm:$0xff] }
 0x54d   :  { %989 = vmatpush.msrb.mxu0 %v1361_v49 }
 0x54f   :  { %990 = vmatpush.msrb.mxu0 %v1360_v6 }
 0x551   :  { %991 = vmatpush.msrb.mxu0 %v1359_v8 }
 0x552   :  { %v1775_v4 = vpop.eup %1416 }
 0x553   :  { %v788_v5 = vsel %vm163_vm1, %v1775_v4, 0.0 }
 0x554   :  { %789 = vadd.xlane.f32.xlu2 %v788_v5 }
 0x5bf   :  { %v787_v25 = vpop.xlane.xlu1 %786 }
 0x5c0   :  { %1418 = vrcp.f32 %v787_v25  ;;  %v802_v30 = vand.u32 2147483648, %v787_v25  ;;  %v800_v7 = vand.u32 2147483647, %v787_v25  ;;  %vm796_vm5 = vweird.f32 %v787_v25 }
 0x5c2   :  { %v803_v36 = vor.u32 1.1754944e-38, %v802_v30  ;;  %vm801_vm7 = vcmp.eq.f32.partialorder %v800_v7, 8.507059e+37 }
 0x5c6   :  { %v1419_v26 = vpop.eup %1418 }
 0x5c7   :  { %v792_v27 = vmul.f32 %v1419_v26, %v787_v25  ;;  %v790_v28 = vpop.xlane.xlu2 %789  ;;  %vm797_vm4 = vweird.f32 %v1419_v26 }
 0x5c8   :  { %1420 = vrcp.f32 %v790_v28  ;;  %vm798_vm6 = vmor %vm796_vm5, %vm797_vm4  ;;  %v817_v41 = vand.u32 2147483648, %v790_v28  ;;  %v815_v43 = vand.u32 2147483647, %v790_v28  ;;  %vm811_vm9 = vweird.f32 %v790_v28 }
 0x5c9   :  { %v793_v29 = vsub.f32 1.0, %v792_v27 }
 0x5ca   :  { %v818_v45 = vor.u32 1.1754944e-38, %v817_v41  ;;  %vm816_vm11 = vcmp.eq.f32.partialorder %v815_v43, 8.507059e+37 }
 0x5cb   :  { %v794_v31 = vmul.f32 %v1419_v26, %v793_v29 }
 0x5cd   :  { %v795_v33 = vadd.f32 %v1419_v26, %v794_v31 }
 0x5ce   :  { %v1421_v35 = vpop.eup %1420 }
 0x5cf   :  { %v799_v37 = vsel %vm798_vm6, %v1419_v26, %v795_v33  ;;  %v807_v38 = vmul.f32 %v1421_v35, %v790_v28  ;;  %vm812_vm8 = vweird.f32 %v1421_v35 }
 0x5d0   :  { %v804_v39 = vsel %vm801_vm7, %v803_v36, %v799_v37  ;;  %vm813_vm10 = vmor %vm811_vm9, %vm812_vm8 }
 0x5d1   :  { %v808_v40 = vsub.f32 1.0, %v807_v38  ;;  %v805_v9 = vmul.f32 %v1415_v1, %v804_v39 }
 0x5d3   :  { %v809_v42 = vmul.f32 %v1421_v35, %v808_v40  ;;  %1340 = vmatmul.msk.f32.vlgmr.msrb.gmra.mxu2 %vm163_vm1, %v805_v9 }
 0x5d4   :  { %1368 = vmatpush.xpose.msk.msrb.mxu2 %vm163_vm1, %v964_v56 }
 0x5d5   :  { %v810_v44 = vadd.f32 %v1421_v35, %v809_v42 }
 0x5d7   :  { %v814_v46 = vsel %vm813_vm10, %v1421_v35, %v810_v44 }
 0x5d8   :  { %v819_v47 = vsel %vm816_vm11, %v818_v45, %v814_v46 }
 0x5d9   :  { %v820_v50 = vmul.f32 %v1775_v4, %v819_v47 }
 0x5db   :  { %1341 = vmatmul.msk.f32.vlgmr.msra.gmra.mxu0 %vm163_vm1, %v820_v50  ;;  %1350 = vmatmul.msk.f32.vlgmr.msra.gmra.mxu2 %vm59_vm0, %v1573_v10 }
 0x5e3   :  { %1351 = vmatmul.msk.f32.gmra.mxu2 %vm59_vm0, %v1584_v11  ;;  %1364 = vmatmul.msk.f32.vlgmr.msrb.gmra.mxu0 %vm59_vm0, %v1615_v32  ;;  %v1394_v32 = vld [vmem:[%s1905_s9 + $0x3] ss:$0 sm:$0xff] }
 0x5eb   :  { %1365 = vmatmul.msk.f32.gmra.mxu0 %vm59_vm0, %v1625_v34 }
 0x656   :  { %v841_v57 = vpop.f32.mrf.mxu2 }
 0x657   :  { %1343 = vmatmul.msk.f32.vlgmr.msrb.gmra.mxu1 %vm163_vm1, %v841_v57  ;;  %v1372_v57 = vld [vmem:[%s1902_s6 + $0x18] sm:$0xff] }
 0x658   :  { %v864_v58 = vpop.f32.mrf.mxu0  ;;  %1170 = vmatpush.msrb.mxu1 %v1372_v57 }
 0x65e   :  { %v927_v59 = vpop.f32.mrf.mxu2 }
 0x65f   :  { %1344 = vmatmul.msk.f32.gmra.mxu1 %vm163_vm1, %v864_v58  ;;  %v928_v61 = vadd.f32 %v1393_v60, %v927_v59 }
 0x660   :  { %v993_v34 = vpop.f32.mrf.mxu0 }
 0x661   :  { %v994_v28 = vadd.f32 %v1394_v32, %v993_v34 }
 0x663   :  { %1119 = vmatpush.msrb.mxu3 %v994_v28 }
 0x666   :  { %v930_v62 = vpop.f32.mrf.mxu2 }
 0x667   :  { %v931_v63 = vadd.f32 %v1393_v60, %v930_v62  ;;  %1367 = vmatmul.msk.f32.vlgmr.msra.gmra.mxu1 %vm163_vm1, %v928_v61  ;;  %v1395_v60 = vld [vmem:[%s1906_s10] ss:$0 sm:$0xff] }
 0x668   :  { %v996_v29 = vpop.f32.mrf.mxu0 }
 0x669   :  { %1369 = vmatmul.msk.f32.vlgmr.msrb.gmra.mxu2 %vm163_vm1, %v931_v63  ;;  %v997_v30 = vadd.f32 %v1394_v32, %v996_v29 }
 0x66b   :  { %1142 = vmatpush.msra.mxu0 %v997_v30 }
 0x6d4   :  { %v892_v1 = vpop.f32.mrf.mxu1 }
 0x6d5   :  { %v1838_v2 = vadd.f32 %v892_v1, %v615_v0 }
 0x6dc   :  { %v895_v4 = vpop.f32.mrf.mxu1 }
 0x6dd   :  { %v1842_v5 = vadd.f32 %v895_v4, %v618_v3 }
 0x6e4   :  { %v1022_v12 = vpop.f32.mrf.mxu1 }
 0x6e5   :  { %v1051_v13 = vmul.f32 0.35355338, %v1022_v12 }
 0x6e7   :  { %v1053_v14 = vsel %vm163_vm1, %v1051_v13, -inf }
 0x6e8   :  { %1054 = vmax.xlane.f32.xlu0 %v1053_v14 }
 0x6ec   :  { %v1048_v15 = vpop.f32.mrf.mxu2 }
 0x6ed   :  { %v1052_v16 = vmul.f32 0.35355338, %v1048_v15  ;;  %v1462_v15 = vmov 32.0  }
 0x6ef   :  { %v1056_v17 = vsel %vm163_vm1, %v1052_v16, -inf }
 0x6f0   :  { %1057 = vmax.xlane.f32.xlu1 %v1056_v17 }
 0x75b   :  { %v1055_v18 = vpop.xlane.xlu0 %1054 }
 0x75c   :  { %v1059_v19 = vsub.f32 %v1051_v13, %v1055_v18 }
 0x75e   :  { %v1061_v20 = vmul.f32 1.442695, %v1059_v19 }
 0x760   :  { %1422 = vpow2.f32 %v1061_v20 }
 0x763   :  { %v1058_v21 = vpop.xlane.xlu1 %1057 }
 0x764   :  { %v1060_v22 = vsub.f32 %v1052_v16, %v1058_v21 }
 0x766   :  { %v1423_v23 = vpop.eup %1422  ;;  %v1063_v24 = vmul.f32 1.442695, %v1060_v22 }
 0x767   :  { %v1065_v25 = vsel %vm163_vm1, %v1423_v23, 0.0 }
 0x768   :  { %1424 = vpow2.f32 %v1063_v24  ;;  %1066 = vadd.xlane.f32.xlu2 %v1065_v25 }
 0x76e   :  { %v1425_v26 = vpop.eup %1424 }
 0x76f   :  { %v1068_v27 = vsel %vm163_vm1, %v1425_v26, 0.0 }
 0x770   :  { %1069 = vadd.xlane.f32.xlu0 %v1068_v27 }
 0x7db   :  { %v1067_v31 = vpop.xlane.xlu2 %1066 }
 0x7dc   :  { %1426 = vrcp.f32 %v1067_v31  ;;  %v1082_v37 = vand.u32 2147483648, %v1067_v31  ;;  %v1080_v39 = vand.u32 2147483647, %v1067_v31  ;;  %vm1076_vm13 = vweird.f32 %v1067_v31 }
 0x7de   :  { %v1083_v41 = vor.u32 1.1754944e-38, %v1082_v37  ;;  %vm1081_vm15 = vcmp.eq.f32.partialorder %v1080_v39, 8.507059e+37  ;;  %v1396_v37 = vld [vmem:[%s1907_s11] ss:$0 sm:$0xff]  ;;  %s1463_s11 = smov [#allocation2]  }
 0x7df   :  { %s1257_s27 = sshll.u32 %s1463_s11, 4  ;;  %s1258_s27 = int_to_ptr.vmem [resolvable:$true] %s1257_s27 }
 0x7e2   :  { %v1427_v7 = vpop.eup %1426 }
 0x7e3   :  { %v1072_v33 = vmul.f32 %v1427_v7, %v1067_v31  ;;  %v1070_v35 = vpop.xlane.xlu0 %1069  ;;  %vm1077_vm12 = vweird.f32 %v1427_v7 }
 0x7e4   :  { %1428 = vrcp.f32 %v1070_v35  ;;  %vm1078_vm14 = vmor %vm1076_vm13, %vm1077_vm12  ;;  %v1097_v47 = vand.u32 2147483648, %v1070_v35  ;;  %v1095_v51 = vand.u32 2147483647, %v1070_v35  ;;  %vm1091_vm3 = vweird.f32 %v1070_v35 }
 0x7e5   :  { %v1073_v36 = vsub.f32 1.0, %v1072_v33  ;;  %1430 = vrcp.f32 %v1462_v15 }
 0x7e6   :  { %v1098_v53 = vor.u32 1.1754944e-38, %v1097_v47  ;;  %vm1096_vm5 = vcmp.eq.f32.partialorder %v1095_v51, 8.507059e+37 }
 0x7e7   :  { %v1074_v38 = vmul.f32 %v1427_v7, %v1073_v36 }
 0x7e9   :  { %v1075_v40 = vadd.f32 %v1427_v7, %v1074_v38 }
 0x7ea   :  { %v1429_v9 = vpop.eup %1428 }
 0x7eb   :  { %v1079_v42 = vsel %vm1078_vm14, %v1427_v7, %v1075_v40  ;;  %v1087_v43 = vmul.f32 %v1429_v9, %v1070_v35  ;;  %vm1092_vm2 = vweird.f32 %v1429_v9  ;;  %v1431_v16 = vpop.eup %1430 }
 0x7ec   :  { %v1084_v44 = vsel %vm1081_vm15, %v1083_v41, %v1079_v42  ;;  %vm1093_vm4 = vmor %vm1091_vm3, %vm1092_vm2  ;;  %v1195_v17 = vmul.f32 32.0, %v1431_v16 }
 0x7ed   :  { %v1088_v45 = vsub.f32 1.0, %v1087_v43  ;;  %v1085_v46 = vmul.f32 %v1423_v23, %v1084_v44 }
 0x7ef   :  { %v1089_v50 = vmul.f32 %v1429_v9, %v1088_v45  ;;  %1370 = vmatmul.msk.f32.vlgmr.msrb.gmra.mxu3 %vm163_vm1, %v1085_v46 }
 0x7f1   :  { %v1090_v52 = vadd.f32 %v1429_v9, %v1089_v50 }
 0x7f3   :  { %v1094_v54 = vsel %vm1093_vm4, %v1429_v9, %v1090_v52  ;;  %v1397_v9 = vld [vmem:[%s1908_s12] ss:$0 sm:$0xff]  ;;  %s1464_s12 = smov 128  }
 0x7f4   :  { %v1099_v55 = vsel %vm1096_vm5, %v1098_v53, %v1094_v54 }
 0x7f5   :  { %v1100_v56 = vmul.f32 %v1425_v26, %v1099_v55 }
 0x7f7   :  { %1371 = vmatmul.msk.f32.vlgmr.msra.gmra.mxu0 %vm163_vm1, %v1100_v56 }
 0x872   :  { %v1121_v58 = vpop.f32.mrf.mxu3 }
 0x873   :  { %1373 = vmatmul.msk.f32.vlgmr.msrb.gmra.mxu1 %vm163_vm1, %v1121_v58 }
 0x874   :  { %v1144_v59 = vpop.f32.mrf.mxu0 }
 0x87b   :  { %1374 = vmatmul.msk.f32.gmra.mxu1 %vm163_vm1, %v1144_v59  ;;  %vm1199_vm1 = vweird.f32 %v1431_v16 }
 0x8f0   :  { %v1172_v61 = vpop.f32.mrf.mxu1 }
 0x8f1   :  { %v1178_v62 = vadd.f32 %v1172_v61, %v1838_v2  ;;  %v1196_v2 = vsub.f32 1.0, %v1195_v17 }
 0x8f3   :  { %v1184_v63 = vadd.f32 %v1395_v60, %v1178_v62  ;;  %v1197_v48 = vmul.f32 %v1431_v16, %v1196_v2 }
 0x8f5   :  { %v1186_v0 = vadd.f32 %v1184_v63, %v1573_v10  ;;  %v1198_v49 = vadd.f32 %v1431_v16, %v1197_v48 }
 0x8f7   :  { %v1188_v1 = vsel %vm59_vm0, %v1186_v0, 0.0  ;;  %v1200_v10 = vsel %vm1199_vm1, %v1431_v16, %v1198_v49 }
 0x8f8   :  { %1189 = vadd.xlane.f32.xlu1 %v1188_v1  ;;  %v1175_v3 = vpop.f32.mrf.mxu1 }
 0x8f9   :  { %v1179_v4 = vadd.f32 %v1175_v3, %v1842_v5 }
 0x8fb   :  { %v1185_v12 = vadd.f32 %v1395_v60, %v1179_v4 }
 0x8fd   :  { %v1187_v13 = vadd.f32 %v1185_v12, %v1584_v11 }
 0x8ff   :  { %v1191_v14 = vsel %vm59_vm0, %v1187_v13, 0.0 }
 0x900   :  { %1192 = vadd.xlane.f32.xlu2 %v1191_v14 }
 0x96b   :  { %v1190_v6 = vpop.xlane.xlu1 %1189 }
 0x96c   :  { %v1201_v8 = vmul.f32 %v1200_v10, %v1190_v6 }
 0x96e   :  { %v1203_v18 = vsub.f32 %v1186_v0, %v1201_v8 }
 0x970   :  { %v1205_v19 = vmul.f32 %v1203_v18, %v1203_v18 }
 0x972   :  { %v1207_v5 = vsel %vm59_vm0, %v1205_v19, 0.0 }
 0x973   :  { %1208 = vadd.xlane.f32.xlu0 %v1207_v5  ;;  %v1193_v11 = vpop.xlane.xlu2 %1192 }
 0x974   :  { %v1202_v20 = vmul.f32 %v1200_v10, %v1193_v11 }
 0x976   :  { %v1204_v21 = vsub.f32 %v1187_v13, %v1202_v20 }
 0x978   :  { %v1206_v22 = vmul.f32 %v1204_v21, %v1204_v21 }
 0x97a   :  { %v1210_v23 = vsel %vm59_vm0, %v1206_v22, 0.0 }
 0x97b   :  { %1211 = vadd.xlane.f32.xlu1 %v1210_v23 }
 0x9e6   :  { %v1209_v24 = vpop.xlane.xlu0 %1208 }
 0x9e7   :  { %v1213_v25 = vmul.f32 %v1209_v24, %v1200_v10 }
 0x9e9   :  { %v1215_v26 = vadd.f32 1e-05, %v1213_v25 }
 0x9eb   :  { %1432 = vrsqrt.f32 %v1215_v26  ;;  %vm1223_vm7 = vweird.f32 %v1215_v26 }
 0x9ee   :  { %v1212_v27 = vpop.xlane.xlu1 %1211 }
 0x9ef   :  { %v1214_v32 = vmul.f32 %v1212_v27, %v1200_v10 }
 0x9f1   :  { %v1433_v34 = vpop.eup %1432  ;;  %v1216_v28 = vadd.f32 1e-05, %v1214_v32 }
 0x9f2   :  { %v1218_v29 = vmul.f32 %v1433_v34, %v1215_v26  ;;  %vm1224_vm6 = vweird.f32 %v1433_v34 }
 0x9f3   :  { %1434 = vrsqrt.f32 %v1216_v28  ;;  %vm1225_vm8 = vmor %vm1223_vm7, %vm1224_vm6  ;;  %vm1233_vm10 = vweird.f32 %v1216_v28 }
 0x9f4   :  { %v1219_v30 = vmul.f32 %v1433_v34, %v1218_v29 }
 0x9f6   :  { %v1220_v31 = vmul.f32 0.5, %v1219_v30 }
 0x9f8   :  { %v1221_v7 = vsub.f32 1.5, %v1220_v31 }
 0x9f9   :  { %v1435_v33 = vpop.eup %1434 }
 0x9fa   :  { %v1222_v35 = vmul.f32 %v1433_v34, %v1221_v7  ;;  %v1228_v36 = vmul.f32 %v1435_v33, %v1216_v28  ;;  %vm1234_vm9 = vweird.f32 %v1435_v33 }
 0x9fb   :  { %vm1235_vm11 = vmor %vm1233_vm10, %vm1234_vm9 }
 0x9fc   :  { %v1226_v38 = vsel %vm1225_vm8, %v1433_v34, %v1222_v35  ;;  %v1229_v39 = vmul.f32 %v1435_v33, %v1228_v36 }
 0x9fd   :  { %v1237_v40 = vmul.f32 %v1226_v38, %v1203_v18 }
 0x9fe   :  { %v1230_v41 = vmul.f32 0.5, %v1229_v39 }
 0x9ff   :  { %v1243_v42 = vmul.f32 %v1396_v37, %v1237_v40 }
 0xa00   :  { %v1231_v43 = vsub.f32 1.5, %v1230_v41 }
 0xa01   :  { %v1249_v44 = vadd.f32 %v1397_v9, %v1243_v42 }
 0xa02   :  { %v1232_v45 = vmul.f32 %v1435_v33, %v1231_v43 }
 0xa03   :  { %1251 = vst.msk [vmem:[#allocation2] sm:$0xff] %vm59_vm0, %v1249_v44 }
 0xa04   :  { %v1236_v46 = vsel %vm1235_vm11, %v1435_v33, %v1232_v45 }
 0xa05   :  { %v1238_v47 = vmul.f32 %v1236_v46, %v1204_v21 }
 0xa07   :  { %v1244_v50 = vmul.f32 %v1396_v37, %v1238_v47 }
 0xa09   :  { %v1250_v51 = vadd.f32 %v1397_v9, %v1244_v50 }
 0xa0b   :  { %1252 = vst.msk [vmem:[#allocation2 + $0x8] sm:$0xff] %vm59_vm0, %v1250_v51 }
 0xa0c   :  { %1265 = dma.vmem_to_hbm [thread:$0]  %s1258_s27, 256, %s1260_s1, [#allocation3], %s1464_s12, %s1464_s12, %s1465_s3  }
 0xa0d   :  { %1460 = dma.done.wait [#allocation3], 256  }
 0xa0e   :  { %1461 = vsyncadd [#allocation3], 4294967040 }
 0xa0f   :  { %1270 = vsyncpa [#allocation3], 1 }

</bundles_post_ra>
